<compile_context>
chip_gen: v5e
topology: v5e:2x2
jax: 0.10.0
libtpu: 0.0.40
codegen_flags: <defaults>
</compile_context>

<pallas_src>
import math
import numpy as np
import jax
import jax.numpy as jnp
from jax.experimental import pallas as pl
from jax.experimental.pallas import tpu as pltpu

LN_EPS = 1e-5          # PyTorch nn.LayerNorm default
SCAN_CHUNK = 128       # timesteps of exp(dt*A) precompute kept resident at once


# ----------------------------- shared math helpers -----------------------------
def _silu(v):
    return v * (1.0 / (1.0 + jnp.exp(-v)))


def _softplus(v):
    # overflow-free: max(v, 0) + log1p(exp(-|v|))
    return jnp.maximum(v, 0.0) + jnp.log1p(jnp.exp(-jnp.abs(v)))


def _layernorm(x, w, b):
    m = jnp.mean(x, axis=-1, keepdims=True)
    c = x - m
    var = jnp.mean(c * c, axis=-1, keepdims=True)
    return c * jax.lax.rsqrt(var + LN_EPS) * w + b


# ----------------------------- fused Pallas kernel -----------------------------
def predictor_kernel(ctx_ref, tte_ref, tve_ref,
                     w_pos_t_ref, w_pos_v_ref, b_pos_ref,
                     w_in_x_ref, w_in_z_ref, conv_w_ref, conv_b_ref,
                     w_dtp_ref, b_dt_ref, w_b_ref, w_c_ref,
                     negA_T_ref, d_ref, w_out_ref,
                     ln_w_ref, ln_b_ref, w_op_ref, b_op_ref,
                     out_ref,
                     x_scr, y_scr, dtx_scr, bm_scr, cm_scr, da_scr):
    l = pl.program_id(1)
    nl = pl.num_programs(1)
    Bb, C_len, D = ctx_ref.shape
    T_len = tte_ref.shape[1]
    L = C_len + T_len
    M = L * Bb                              # time-major rows: row = t*Bb + b
    din = w_in_x_ref.shape[-1]
    KC = conv_w_ref.shape[0]
    N = negA_T_ref.shape[0]
    T_out = out_ref.shape[1]
    CH = da_scr.shape[0] // Bb              # scan-precompute chunk (timesteps)
    wdt = w_in_x_ref.dtype                  # matmul weight dtype (f32 or bf16)

    def to_tm(ref):                         # (Bb, S, D) block -> (S*Bb, D) time-major
        if Bb == 1:
            return ref[0]
        return jnp.transpose(ref[...], (1, 0, 2)).reshape(-1, ref.shape[-1])

    # ---- first layer step: build x = [context ; position_proj(targets)] in VMEM ----
    @pl.when(l == 0)
    def _():
        tpos = (jnp.dot(to_tm(tte_ref).astype(wdt), w_pos_t_ref[...],
                        preferred_element_type=jnp.float32)
                + jnp.dot(to_tm(tve_ref).astype(wdt), w_pos_v_ref[...],
                          preferred_element_type=jnp.float32)
                + b_pos_ref[...])
        x_scr[:C_len * Bb, :] = to_tm(ctx_ref).astype(jnp.float32)
        x_scr[C_len * Bb:, :] = tpos

    # ---- one Mamba mixer layer; x stays resident in VMEM across the layer axis ----
    x = x_scr[...]                                                        # (M, D) f32
    xl = x.astype(wdt)
    xc = jnp.dot(xl, w_in_x_ref[...], preferred_element_type=jnp.float32)  # (M, din)
    z = jnp.dot(xl, w_in_z_ref[...], preferred_element_type=jnp.float32)   # (M, din)

    # causal depthwise conv (left pad KC-1): XLU roll by whole timesteps + wrap masks
    conv_w = conv_w_ref[...]                                              # (KC, din)
    row_ids = jax.lax.broadcasted_iota(jnp.int32, (M, din), 0)
    acc = xc * conv_w[KC - 1:KC, :]
    for s in range(1, KC):
        shifted = pltpu.roll(xc, shift=s * Bb, axis=0)                    # t <- t-s (wraps)
        shifted = jnp.where(row_ids >= s * Bb, shifted, 0.0)              # kill wrapped rows
        acc = acc + shifted * conv_w[KC - 1 - s:KC - s, :]
    xc_act = _silu(acc + conv_b_ref[...])                                 # (M, din)

    # x_proj (+ folded low-rank dt_proj): three lane-aligned dots, results to scratch
    xca = xc_act.astype(wdt)
    dt = _softplus(jnp.dot(xca, w_dtp_ref[...], preferred_element_type=jnp.float32)
                   + b_dt_ref[...])                                       # (M, din)
    bm_scr[...] = jnp.dot(xca, w_b_ref[...], preferred_element_type=jnp.float32)  # (M, N)
    cm_scr[...] = jnp.dot(xca, w_c_ref[...], preferred_element_type=jnp.float32)  # (M, N)
    dtx_scr[...] = dt * xc_act                                            # (M, din)

    # ---- selective scan: chunked EUP exp precompute + fori_loop recurrence ----
    negA_T = negA_T_ref[...]                                              # (N, din)
    h = jnp.zeros((Bb, N, din), jnp.float32)

    def scan_chunk(c0, cl, h):
        da_scr[:cl * Bb] = jnp.exp(dt[c0 * Bb:(c0 + cl) * Bb, None, :]
                                   * negA_T[None, :, :])                  # hoisted exp

        def step(ti, h):
            rl = pl.ds(ti * Bb, Bb)                                       # chunk-local rows
            rg = pl.ds((c0 + ti) * Bb, Bb)                                # global rows
            b_t = bm_scr[rg]                                              # (Bb, N)
            u_t = dtx_scr[rg]                                             # (Bb, din)
            c_t = cm_scr[rg]                                              # (Bb, N)
            h = da_scr[rl] * h + b_t[:, :, None] * u_t[:, None, :]        # 1 FMA + bcast-mul
            y_scr[rg] = jnp.sum(c_t[:, :, None] * h, axis=1)              # (Bb, din)
            return h

        return jax.lax.fori_loop(0, cl, step, h)

    for c0 in range(0, L, CH):                                            # static chunk loop
        h = scan_chunk(c0, min(CH, L - c0), h)

    # ---- gating + out_proj + residual (skip-term hoisted out of the scan) ----
    y = (y_scr[...] + d_ref[...] * xc_act) * _silu(z)
    x_new = x + jnp.dot(y.astype(wdt), w_out_ref[...],
                        preferred_element_type=jnp.float32)               # (M, D)
    x_scr[...] = x_new

    # ---- last layer step: LayerNorm, target slice, output_proj ----
    @pl.when(l == nl - 1)
    def _():
        xn = _layernorm(x_new, ln_w_ref[...], ln_b_ref[...])
        tgt = xn[(L - T_out) * Bb:, :]                                    # (T_out*Bb, D)
        pred = (jnp.dot(tgt.astype(wdt), w_op_ref[...],
                        preferred_element_type=jnp.float32) + b_op_ref[...])
        if Bb == 1:
            out_ref[0] = pred.astype(out_ref.dtype)
        else:
            out_ref[...] = jnp.transpose(pred.reshape(T_out, Bb, D),
                                         (1, 0, 2)).astype(out_ref.dtype)


# ----------------------------- wrapper -----------------------------
def _pick_block_batch(B, L):
    # Fill the MXU M dimension (Bb*L rows) while keeping >= 2 blocks along the
    # "parallel" batch axis when possible (v7x has 2 TensorCores per chip).
    best = 1
    for d in range(1, B + 1):
        if B % d:
            continue
        if d * L <= max(L, 128) and (B // d >= 2 or B < 2):
            best = d
    return best


def masked_target_predictor(context_repr, target_time_emb, target_var_emb,
                            target_count, params, *, block_batch=None,
                            param_dtype=jnp.float32):
    # TODO(synk): target_count is treated as a static Python int (it fixes the output shape).
    B, C_len, D = context_repr.shape
    T_len = target_time_emb.shape[1]
    L = C_len + T_len
    target_count = int(target_count)
    layers = params['layers']
    nl = len(layers)
    din = layers[0]['w_in'].shape[1] // 2
    R = layers[0]['w_dt'].shape[0]
    N = layers[0]['a_logT'].shape[0]

    bb = _pick_block_batch(B, L) if block_batch is None else int(block_batch)
    assert B % bb == 0
    nb = B // bb
    ch = min(L, SCAN_CHUNK)

    # Host-side weight prep (once per weight set):
    #  * split concat-ed projections so every in-kernel slice boundary is lane-aligned,
    #  * fold the rank-R dt projection into x_proj (kept in f32),
    #  * stack per-layer weights on a leading layer axis (streamed one layer / grid step).
    w_pos = params['w_pos']
    w_pos_t = w_pos[:D].astype(param_dtype)
    w_pos_v = w_pos[D:].astype(param_dtype)
    w_in_x = jnp.stack([p['w_in'][:, :din] for p in layers]).astype(param_dtype)
    w_in_z = jnp.stack([p['w_in'][:, din:] for p in layers]).astype(param_dtype)
    conv_w = jnp.stack([p['conv_w'] for p in layers])
    conv_b = jnp.stack([p['conv_b'] for p in layers])
    w_dtp = jnp.stack([p['w_xproj'][:, :R] @ p['w_dt'] for p in layers]).astype(param_dtype)
    w_bm = jnp.stack([p['w_xproj'][:, R:R + N] for p in layers]).astype(param_dtype)
    w_cm = jnp.stack([p['w_xproj'][:, R + N:R + 2 * N] for p in layers]).astype(param_dtype)
    b_dt = jnp.stack([p['b_dt'] for p in layers])
    negA_T = jnp.stack([-jnp.exp(p['a_logT']) for p in layers])
    d_skip = jnp.stack([p['d'] for p in layers])
    w_out = jnp.stack([p['w_out'] for p in layers]).astype(param_dtype)
    ln_w, ln_b = params['ln_w'], params['ln_b']
    w_op = params['w_oproj'].astype(param_dtype)
    b_op = params['b_oproj']

    def lspec(a):      # per-layer stacked weight: stream one layer per grid step
        return pl.BlockSpec((None,) + a.shape[1:],
                            lambda b, l, r=a.ndim - 1: (l,) + (0,) * r)

    def cspec(a):      # constant: block index never changes -> fetched once
        return pl.BlockSpec(a.shape, lambda b, l, r=a.ndim: (0,) * r)

    in_specs = [
        pl.BlockSpec((bb, C_len, D), lambda b, l: (b, 0, 0)),
        pl.BlockSpec((bb, T_len, D), lambda b, l: (b, 0, 0)),
        pl.BlockSpec((bb, T_len, D), lambda b, l: (b, 0, 0)),
        cspec(w_pos_t), cspec(w_pos_v), cspec(params['b_pos']),
        lspec(w_in_x), lspec(w_in_z), lspec(conv_w), lspec(conv_b),
        lspec(w_dtp), lspec(b_dt), lspec(w_bm), lspec(w_cm),
        lspec(negA_T), lspec(d_skip), lspec(w_out),
        cspec(ln_w), cspec(ln_b), cspec(w_op), cspec(b_op),
    ]

    scratch_shapes = [
        pltpu.VMEM((L * bb, D), jnp.float32),        # x, resident across the layer axis
        pltpu.VMEM((L * bb, din), jnp.float32),      # scan output y
        pltpu.VMEM((L * bb, din), jnp.float32),      # dt * conv(x)
        pltpu.VMEM((L * bb, N), jnp.float32),        # B(t)
        pltpu.VMEM((L * bb, N), jnp.float32),        # C(t)
        pltpu.VMEM((ch * bb, N, din), jnp.float32),  # exp(dt*A) chunk
    ]

    return pl.pallas_call(
        predictor_kernel,
        out_shape=jax.ShapeDtypeStruct((B, target_count, D), context_repr.dtype),
        grid=(nb, nl),
        in_specs=in_specs,
        out_specs=pl.BlockSpec((bb, target_count, D), lambda b, l: (b, 0, 0)),
        scratch_shapes=scratch_shapes,
        compiler_params=pltpu.CompilerParams(
            dimension_semantics=("parallel", "arbitrary"),
            vmem_limit_bytes=64 * 1024 * 1024),
    )(context_repr, target_time_emb, target_var_emb,
      w_pos_t, w_pos_v, params['b_pos'],
      w_in_x, w_in_z, conv_w, conv_b,
      w_dtp, b_dt, w_bm, w_cm, negA_T, d_skip, w_out,
      ln_w, ln_b, w_op, b_op)


# ----------------------------- deterministic parameter init -----------------------------
def init_params(key, D, d_state, d_conv, expand, num_layers):
    din = expand * D
    R = max(1, math.ceil(D / 16))          # dt_rank = ceil(d_model / 16)
    key, k_pos, k_posb, k_op, k_opb = jax.random.split(key, 5)
    layers = []
    for _ in range(num_layers):
        key, *ks = jax.random.split(key, 8)
        layers.append(dict(
            w_in=jax.random.normal(ks[0], (D, 2 * din), jnp.float32) * D ** -0.5,
            conv_w=jax.random.normal(ks[1], (d_conv, din), jnp.float32) * d_conv ** -0.5,
            conv_b=jax.random.normal(ks[2], (1, din), jnp.float32) * 0.1,
            w_xproj=jax.random.normal(ks[3], (din, R + 2 * d_state), jnp.float32) * din ** -0.5,
            w_dt=jax.random.normal(ks[4], (R, din), jnp.float32) * R ** -0.5,
            b_dt=jax.random.normal(ks[5], (1, din), jnp.float32) * 0.1,
            # A = repeat(arange(1, d_state+1)); stored transposed: (d_state, d_inner)
            a_logT=jnp.log(jnp.tile(
                jnp.arange(1, d_state + 1, dtype=jnp.float32)[:, None], (1, din))),
            d=jnp.ones((1, din), jnp.float32),
            w_out=jax.random.normal(ks[6], (din, D), jnp.float32) * din ** -0.5,
        ))
    return dict(
        layers=layers,
        w_pos=jax.random.normal(k_pos, (2 * D, D), jnp.float32) * (2 * D) ** -0.5,
        b_pos=jax.random.normal(k_posb, (1, D), jnp.float32) * 0.1,
        ln_w=jnp.ones((1, D), jnp.float32),
        ln_b=jnp.zeros((1, D), jnp.float32),
        w_oproj=jax.random.normal(k_op, (D, D), jnp.float32) * D ** -0.5,
        b_oproj=jax.random.normal(k_opb, (1, D), jnp.float32) * 0.1,
    )


# ----------------------------- pure-JAX reference -----------------------------
def ref_predictor(context_repr, target_time_emb, target_var_emb, target_count, params):
    def ln(v):
        m = v.mean(-1, keepdims=True)
        c = v - m
        var = (c * c).mean(-1, keepdims=True)
        return c * jax.lax.rsqrt(var + LN_EPS) * params['ln_w'][0] + params['ln_b'][0]

    def mamba(xs, p):                       # xs: (L, D) -> (L, D)
        L = xs.shape[0]
        din = p['w_in'].shape[1] // 2
        KC = p['conv_w'].shape[0]
        R = p['w_dt'].shape[0]
        N = p['a_logT'].shape[0]
        xz = xs @ p['w_in']
        xc, z = xz[:, :din], xz[:, din:]
        acc = xc * p['conv_w'][KC - 1]
        for s in range(1, KC):
            shifted = jnp.concatenate([jnp.zeros((s, din)), xc[:L - s]], 0)
            acc = acc + shifted * p['conv_w'][KC - 1 - s]
        xc_act = _silu(acc + p['conv_b'][0])
        x_dbl = xc_act @ p['w_xproj']
        dt = _softplus(x_dbl[:, :R] @ p['w_dt'] + p['b_dt'][0])
        Bm = x_dbl[:, R:R + N]
        Cm = x_dbl[:, R + N:R + 2 * N]
        A_T = -jnp.exp(p['a_logT'])

        def step(h, inp):
            dt_t, x_t, B_t, C_t = inp
            dA = jnp.exp(dt_t[None, :] * A_T)
            h = dA * h + B_t[:, None] * (dt_t * x_t)[None, :]
            y = C_t @ h + p['d'][0] * x_t
            return h, y

        _, ys = jax.lax.scan(step, jnp.zeros((N, din)), (dt, xc_act, Bm, Cm))
        return (ys * _silu(z)) @ p['w_out']

    tcat = jnp.concatenate([target_time_emb, target_var_emb], axis=-1)
    tpos = tcat @ params['w_pos'] + params['b_pos'][0]
    x = jnp.concatenate([context_repr, tpos], axis=1)           # (B, L, D)

    def one(xb):
        for p in params['layers']:
            xb = xb + mamba(xb, p)
        xb = ln(xb)
        tgt = xb[xb.shape[0] - target_count:]
        return tgt @ params['w_oproj'] + params['b_oproj'][0]

    return jax.vmap(one)(x)


# ----------------------------- main -----------------------------
if __name__ == "__main__":
    # IMTSConfig-like small config
    B, C_len, T_len, D = 2, 6, 2, 32
    d_state, d_conv, expand, predictor_layers = 16, 4, 2, 2
    target_count = T_len

    key = jax.random.PRNGKey(0)
    k_ctx, k_t, k_v, k_p = jax.random.split(key, 4)
    context_repr = jax.random.normal(k_ctx, (B, C_len, D), jnp.float32)
    target_time_emb = jax.random.normal(k_t, (B, T_len, D), jnp.float32)
    target_var_emb = jax.random.normal(k_v, (B, T_len, D), jnp.float32)
    params = init_params(k_p, D, d_state, d_conv, expand, predictor_layers)

    out = jax.block_until_ready(
        masked_target_predictor(context_repr, target_time_emb, target_var_emb,
                                target_count, params))
    ref = jax.block_until_ready(
        ref_predictor(context_repr, target_time_emb, target_var_emb,
                      target_count, params))

    assert out.shape == (B, target_count, D)
    np.testing.assert_allclose(np.asarray(out), np.asarray(ref), rtol=2e-2, atol=2e-2)
    print("KERNEL_OK")
</pallas_src>

<mosaic_0001>
module attributes {stable_mosaic.version = 11 : i64} {
  func.func @predictor_kernel(%arg0: i32, %arg1: i32, %arg2: memref<1x6x32xf32, #tpu.memory_space<vmem>>, %arg3: memref<1x2x32xf32, #tpu.memory_space<vmem>>, %arg4: memref<1x2x32xf32, #tpu.memory_space<vmem>>, %arg5: memref<32x32xf32, #tpu.memory_space<vmem>>, %arg6: memref<32x32xf32, #tpu.memory_space<vmem>>, %arg7: memref<1x32xf32, #tpu.memory_space<vmem>>, %arg8: memref<1x32x64xf32, #tpu.memory_space<vmem>>, %arg9: memref<1x32x64xf32, #tpu.memory_space<vmem>>, %arg10: memref<1x4x64xf32, #tpu.memory_space<vmem>>, %arg11: memref<1x1x64xf32, #tpu.memory_space<vmem>>, %arg12: memref<1x64x64xf32, #tpu.memory_space<vmem>>, %arg13: memref<1x1x64xf32, #tpu.memory_space<vmem>>, %arg14: memref<1x64x16xf32, #tpu.memory_space<vmem>>, %arg15: memref<1x64x16xf32, #tpu.memory_space<vmem>>, %arg16: memref<1x16x64xf32, #tpu.memory_space<vmem>>, %arg17: memref<1x1x64xf32, #tpu.memory_space<vmem>>, %arg18: memref<1x64x32xf32, #tpu.memory_space<vmem>>, %arg19: memref<1x32xf32, #tpu.memory_space<vmem>>, %arg20: memref<1x32xf32, #tpu.memory_space<vmem>>, %arg21: memref<32x32xf32, #tpu.memory_space<vmem>>, %arg22: memref<1x32xf32, #tpu.memory_space<vmem>>, %arg23: memref<1x2x32xf32, #tpu.memory_space<vmem>>, %arg24: memref<8x32xf32, #tpu.memory_space<vmem>>, %arg25: memref<8x64xf32, #tpu.memory_space<vmem>>, %arg26: memref<8x64xf32, #tpu.memory_space<vmem>>, %arg27: memref<8x16xf32, #tpu.memory_space<vmem>>, %arg28: memref<8x16xf32, #tpu.memory_space<vmem>>, %arg29: memref<8x16x64xf32, #tpu.memory_space<vmem>>) attributes {dimension_semantics = [#tpu.dimension_semantics<parallel>, #tpu.dimension_semantics<arbitrary>], iteration_bounds = array<i64: 2, 2>, scalar_prefetch = 0 : i64, scratch_operands = 6 : i64, tpu.core_type = #tpu.core_type<tc>, window_params = [{transform_indices = @transform_0, window_bounds = array<i64: 1, 6, 32>}, {transform_indices = @transform_1, window_bounds = array<i64: 1, 2, 32>}, {transform_indices = @transform_2, window_bounds = array<i64: 1, 2, 32>}, {pipeline_mode = #tpu.pipeline_mode<synchronous>, transform_indices = @transform_3, window_bounds = array<i64: 32, 32>}, {pipeline_mode = #tpu.pipeline_mode<synchronous>, transform_indices = @transform_4, window_bounds = array<i64: 32, 32>}, {pipeline_mode = #tpu.pipeline_mode<synchronous>, transform_indices = @transform_5, window_bounds = array<i64: 1, 32>}, {transform_indices = @transform_6, window_bounds = array<i64: 1, 32, 64>}, {transform_indices = @transform_7, window_bounds = array<i64: 1, 32, 64>}, {transform_indices = @transform_8, window_bounds = array<i64: 1, 4, 64>}, {transform_indices = @transform_9, window_bounds = array<i64: 1, 1, 64>}, {transform_indices = @transform_10, window_bounds = array<i64: 1, 64, 64>}, {transform_indices = @transform_11, window_bounds = array<i64: 1, 1, 64>}, {transform_indices = @transform_12, window_bounds = array<i64: 1, 64, 16>}, {transform_indices = @transform_13, window_bounds = array<i64: 1, 64, 16>}, {transform_indices = @transform_14, window_bounds = array<i64: 1, 16, 64>}, {transform_indices = @transform_15, window_bounds = array<i64: 1, 1, 64>}, {transform_indices = @transform_16, window_bounds = array<i64: 1, 64, 32>}, {pipeline_mode = #tpu.pipeline_mode<synchronous>, transform_indices = @transform_17, window_bounds = array<i64: 1, 32>}, {pipeline_mode = #tpu.pipeline_mode<synchronous>, transform_indices = @transform_18, window_bounds = array<i64: 1, 32>}, {pipeline_mode = #tpu.pipeline_mode<synchronous>, transform_indices = @transform_19, window_bounds = array<i64: 32, 32>}, {pipeline_mode = #tpu.pipeline_mode<synchronous>, transform_indices = @transform_20, window_bounds = array<i64: 1, 32>}, {transform_indices = @transform_21, window_bounds = array<i64: 1, 2, 32>}]} {
    %c0_i32 = arith.constant 0 : i32
    %0 = arith.cmpi eq, %arg1, %c0_i32 : i32
    %1 = arith.extui %0 : i1 to i32
    %c0_i32_0 = arith.constant 0 : i32
    %2 = arith.cmpi ne, %1, %c0_i32_0 : i32
    scf.if %2 {
      %c0_73 = arith.constant 0 : index
      %c0_74 = arith.constant 0 : index
      %c0_75 = arith.constant 0 : index
      %115 = vector.load %arg3[%c0_73, %c0_74, %c0_75] : memref<1x2x32xf32, #tpu.memory_space<vmem>>, vector<1x2x32xf32>
      %116 = vector.shape_cast %115 : vector<1x2x32xf32> to vector<2x32xf32>
      %c0_76 = arith.constant 0 : index
      %c0_77 = arith.constant 0 : index
      %117 = vector.load %arg5[%c0_76, %c0_77] : memref<32x32xf32, #tpu.memory_space<vmem>>, vector<32x32xf32>
      %cst_78 = arith.constant dense<0.000000e+00> : vector<2x32xf32>
      %118 = tpu.matmul %116, %117, %cst_78 {dimension_numbers = #tpu.dot_dimension_numbers<[1], [0], [0], [1], [0, 0, 1, 1], [], []>} : vector<2x32xf32>, vector<32x32xf32>, vector<2x32xf32> -> vector<2x32xf32>
      %c0_79 = arith.constant 0 : index
      %c0_80 = arith.constant 0 : index
      %c0_81 = arith.constant 0 : index
      %119 = vector.load %arg4[%c0_79, %c0_80, %c0_81] : memref<1x2x32xf32, #tpu.memory_space<vmem>>, vector<1x2x32xf32>
      %120 = vector.shape_cast %119 : vector<1x2x32xf32> to vector<2x32xf32>
      %c0_82 = arith.constant 0 : index
      %c0_83 = arith.constant 0 : index
      %121 = vector.load %arg6[%c0_82, %c0_83] : memref<32x32xf32, #tpu.memory_space<vmem>>, vector<32x32xf32>
      %cst_84 = arith.constant dense<0.000000e+00> : vector<2x32xf32>
      %122 = tpu.matmul %120, %121, %cst_84 {dimension_numbers = #tpu.dot_dimension_numbers<[1], [0], [0], [1], [0, 0, 1, 1], [], []>} : vector<2x32xf32>, vector<32x32xf32>, vector<2x32xf32> -> vector<2x32xf32>
      %123 = arith.addf %118, %122 : vector<2x32xf32>
      %c0_85 = arith.constant 0 : index
      %c0_86 = arith.constant 0 : index
      %124 = vector.load %arg7[%c0_85, %c0_86] : memref<1x32xf32, #tpu.memory_space<vmem>>, vector<1x32xf32>
      %125 = vector.broadcast %124 : vector<1x32xf32> to vector<2x32xf32>
      %126 = arith.addf %123, %125 : vector<2x32xf32>
      %c0_87 = arith.constant 0 : index
      %c0_88 = arith.constant 0 : index
      %c0_89 = arith.constant 0 : index
      %127 = vector.load %arg2[%c0_87, %c0_88, %c0_89] : memref<1x6x32xf32, #tpu.memory_space<vmem>>, vector<1x6x32xf32>
      %128 = vector.shape_cast %127 : vector<1x6x32xf32> to vector<6x32xf32>
      %c0_90 = arith.constant 0 : index
      %c0_91 = arith.constant 0 : index
      %129 = vector.load %arg24[%c0_90, %c0_91] : memref<8x32xf32, #tpu.memory_space<vmem>>, vector<6x32xf32>
      tpu.vector_store %arg24[%c0_90, %c0_91], %128 {strides = array<i32>} : memref<8x32xf32, #tpu.memory_space<vmem>>, vector<6x32xf32>,
      %c6 = arith.constant 6 : index
      %c0_92 = arith.constant 0 : index
      %130 = vector.load %arg24[%c6, %c0_92] : memref<8x32xf32, #tpu.memory_space<vmem>>, vector<2x32xf32>
      tpu.vector_store %arg24[%c6, %c0_92], %126 {strides = array<i32>} : memref<8x32xf32, #tpu.memory_space<vmem>>, vector<2x32xf32>,
    } else {
    }
    %c0 = arith.constant 0 : index
    %c0_1 = arith.constant 0 : index
    %3 = vector.load %arg24[%c0, %c0_1] : memref<8x32xf32, #tpu.memory_space<vmem>>, vector<8x32xf32>
    %c0_2 = arith.constant 0 : index
    %c0_3 = arith.constant 0 : index
    %c0_4 = arith.constant 0 : index
    %4 = vector.load %arg8[%c0_2, %c0_3, %c0_4] : memref<1x32x64xf32, #tpu.memory_space<vmem>>, vector<1x32x64xf32>
    %5 = vector.shape_cast %4 : vector<1x32x64xf32> to vector<32x64xf32>
    %cst = arith.constant dense<0.000000e+00> : vector<8x64xf32>
    %6 = tpu.matmul %3, %5, %cst {dimension_numbers = #tpu.dot_dimension_numbers<[1], [0], [0], [1], [0, 0, 1, 1], [], []>} : vector<8x32xf32>, vector<32x64xf32>, vector<8x64xf32> -> vector<8x64xf32>
    %c0_5 = arith.constant 0 : index
    %c0_6 = arith.constant 0 : index
    %c0_7 = arith.constant 0 : index
    %7 = vector.load %arg9[%c0_5, %c0_6, %c0_7] : memref<1x32x64xf32, #tpu.memory_space<vmem>>, vector<1x32x64xf32>
    %8 = vector.shape_cast %7 : vector<1x32x64xf32> to vector<32x64xf32>
    %cst_8 = arith.constant dense<0.000000e+00> : vector<8x64xf32>
    %9 = tpu.matmul %3, %8, %cst_8 {dimension_numbers = #tpu.dot_dimension_numbers<[1], [0], [0], [1], [0, 0, 1, 1], [], []>} : vector<8x32xf32>, vector<32x64xf32>, vector<8x64xf32> -> vector<8x64xf32>
    %c0_9 = arith.constant 0 : index
    %c0_10 = arith.constant 0 : index
    %c0_11 = arith.constant 0 : index
    %10 = vector.load %arg10[%c0_9, %c0_10, %c0_11] : memref<1x4x64xf32, #tpu.memory_space<vmem>>, vector<1x4x64xf32>
    %11 = vector.shape_cast %10 : vector<1x4x64xf32> to vector<4x64xf32>
    %12 = tpu.iota {dimensions = array<i32: 0>} : vector<8x64xi32>
    %13 = vector.extract_strided_slice %11 {offsets = [3, 0], sizes = [1, 64], strides = [1, 1]} : vector<4x64xf32> to vector<1x64xf32>
    %14 = vector.broadcast %13 : vector<1x64xf32> to vector<8x64xf32>
    %15 = arith.mulf %6, %14 : vector<8x64xf32>
    %c1_i32 = arith.constant 1 : i32
    %16 = tpu.dynamic_rotate %6 by %c1_i32 dim 0 : vector<8x64xf32>, i32 -> vector<8x64xf32>
    %c1_i32_12 = arith.constant 1 : i32
    %17 = vector.broadcast %c1_i32_12 : i32 to vector<8x64xi32>
    %18 = arith.cmpi sge, %12, %17 : vector<8x64xi32>
    %cst_13 = arith.constant 0.000000e+00 : f32
    %19 = vector.broadcast %cst_13 : f32 to vector<8x64xf32>
    %20 = arith.select %18, %16, %19 : vector<8x64xi1>, vector<8x64xf32>
    %21 = vector.extract_strided_slice %11 {offsets = [2, 0], sizes = [1, 64], strides = [1, 1]} : vector<4x64xf32> to vector<1x64xf32>
    %22 = vector.broadcast %21 : vector<1x64xf32> to vector<8x64xf32>
    %23 = arith.mulf %20, %22 : vector<8x64xf32>
    %24 = arith.addf %15, %23 : vector<8x64xf32>
    %c2_i32 = arith.constant 2 : i32
    %25 = tpu.dynamic_rotate %6 by %c2_i32 dim 0 : vector<8x64xf32>, i32 -> vector<8x64xf32>
    %c2_i32_14 = arith.constant 2 : i32
    %26 = vector.broadcast %c2_i32_14 : i32 to vector<8x64xi32>
    %27 = arith.cmpi sge, %12, %26 : vector<8x64xi32>
    %cst_15 = arith.constant 0.000000e+00 : f32
    %28 = vector.broadcast %cst_15 : f32 to vector<8x64xf32>
    %29 = arith.select %27, %25, %28 : vector<8x64xi1>, vector<8x64xf32>
    %30 = vector.extract_strided_slice %11 {offsets = [1, 0], sizes = [1, 64], strides = [1, 1]} : vector<4x64xf32> to vector<1x64xf32>
    %31 = vector.broadcast %30 : vector<1x64xf32> to vector<8x64xf32>
    %32 = arith.mulf %29, %31 : vector<8x64xf32>
    %33 = arith.addf %24, %32 : vector<8x64xf32>
    %c3_i32 = arith.constant 3 : i32
    %34 = tpu.dynamic_rotate %6 by %c3_i32 dim 0 : vector<8x64xf32>, i32 -> vector<8x64xf32>
    %c3_i32_16 = arith.constant 3 : i32
    %35 = vector.broadcast %c3_i32_16 : i32 to vector<8x64xi32>
    %36 = arith.cmpi sge, %12, %35 : vector<8x64xi32>
    %cst_17 = arith.constant 0.000000e+00 : f32
    %37 = vector.broadcast %cst_17 : f32 to vector<8x64xf32>
    %38 = arith.select %36, %34, %37 : vector<8x64xi1>, vector<8x64xf32>
    %39 = vector.extract_strided_slice %11 {offsets = [0, 0], sizes = [1, 64], strides = [1, 1]} : vector<4x64xf32> to vector<1x64xf32>
    %40 = vector.broadcast %39 : vector<1x64xf32> to vector<8x64xf32>
    %41 = arith.mulf %38, %40 : vector<8x64xf32>
    %42 = arith.addf %33, %41 : vector<8x64xf32>
    %c0_18 = arith.constant 0 : index
    %c0_19 = arith.constant 0 : index
    %c0_20 = arith.constant 0 : index
    %43 = vector.load %arg11[%c0_18, %c0_19, %c0_20] : memref<1x1x64xf32, #tpu.memory_space<vmem>>, vector<1x1x64xf32>
    %44 = vector.shape_cast %43 : vector<1x1x64xf32> to vector<1x64xf32>
    %45 = vector.broadcast %44 : vector<1x64xf32> to vector<8x64xf32>
    %46 = arith.addf %42, %45 : vector<8x64xf32>
    %cst_21 = arith.constant 0.000000e+00 : f32
    %47 = vector.broadcast %cst_21 : f32 to vector<8x64xf32>
    %48 = arith.subf %47, %46 : vector<8x64xf32>
    %49 = math.exp %48 : vector<8x64xf32>
    %cst_22 = arith.constant 1.000000e+00 : f32
    %50 = vector.broadcast %cst_22 : f32 to vector<8x64xf32>
    %51 = arith.addf %50, %49 : vector<8x64xf32>
    %cst_23 = arith.constant 1.000000e+00 : f32
    %52 = vector.broadcast %cst_23 : f32 to vector<8x64xf32>
    %53 = arith.divf %52, %51 : vector<8x64xf32>
    %54 = arith.mulf %46, %53 : vector<8x64xf32>
    %c0_24 = arith.constant 0 : index
    %c0_25 = arith.constant 0 : index
    %c0_26 = arith.constant 0 : index
    %55 = vector.load %arg12[%c0_24, %c0_25, %c0_26] : memref<1x64x64xf32, #tpu.memory_space<vmem>>, vector<1x64x64xf32>
    %56 = vector.shape_cast %55 : vector<1x64x64xf32> to vector<64x64xf32>
    %cst_27 = arith.constant dense<0.000000e+00> : vector<8x64xf32>
    %57 = tpu.matmul %54, %56, %cst_27 {dimension_numbers = #tpu.dot_dimension_numbers<[1], [0], [0], [1], [0, 0, 1, 1], [], []>} : vector<8x64xf32>, vector<64x64xf32>, vector<8x64xf32> -> vector<8x64xf32>
    %c0_28 = arith.constant 0 : index
    %c0_29 = arith.constant 0 : index
    %c0_30 = arith.constant 0 : index
    %58 = vector.load %arg13[%c0_28, %c0_29, %c0_30] : memref<1x1x64xf32, #tpu.memory_space<vmem>>, vector<1x1x64xf32>
    %59 = vector.shape_cast %58 : vector<1x1x64xf32> to vector<1x64xf32>
    %60 = vector.broadcast %59 : vector<1x64xf32> to vector<8x64xf32>
    %61 = arith.addf %57, %60 : vector<8x64xf32>
    %cst_31 = arith.constant 0.000000e+00 : f32
    %62 = vector.broadcast %cst_31 : f32 to vector<8x64xf32>
    %63 = arith.maximumf %61, %62 : vector<8x64xf32>
    %64 = math.absf %61 : vector<8x64xf32>
    %cst_32 = arith.constant 0.000000e+00 : f32
    %65 = vector.broadcast %cst_32 : f32 to vector<8x64xf32>
    %66 = arith.subf %65, %64 : vector<8x64xf32>
    %67 = math.exp %66 : vector<8x64xf32>
    %68 = math.log1p %67 : vector<8x64xf32>
    %69 = arith.addf %63, %68 : vector<8x64xf32>
    %c0_33 = arith.constant 0 : index
    %c0_34 = arith.constant 0 : index
    %c0_35 = arith.constant 0 : index
    %70 = vector.load %arg14[%c0_33, %c0_34, %c0_35] : memref<1x64x16xf32, #tpu.memory_space<vmem>>, vector<1x64x16xf32>
    %71 = vector.shape_cast %70 : vector<1x64x16xf32> to vector<64x16xf32>
    %cst_36 = arith.constant dense<0.000000e+00> : vector<8x16xf32>
    %72 = tpu.matmul %54, %71, %cst_36 {dimension_numbers = #tpu.dot_dimension_numbers<[1], [0], [0], [1], [0, 0, 1, 1], [], []>} : vector<8x64xf32>, vector<64x16xf32>, vector<8x16xf32> -> vector<8x16xf32>
    %c0_37 = arith.constant 0 : index
    %c0_38 = arith.constant 0 : index
    %73 = vector.load %arg27[%c0_37, %c0_38] : memref<8x16xf32, #tpu.memory_space<vmem>>, vector<8x16xf32>
    tpu.vector_store %arg27[%c0_37, %c0_38], %72 {strides = array<i32>} : memref<8x16xf32, #tpu.memory_space<vmem>>, vector<8x16xf32>,
    %c0_39 = arith.constant 0 : index
    %c0_40 = arith.constant 0 : index
    %c0_41 = arith.constant 0 : index
    %74 = vector.load %arg15[%c0_39, %c0_40, %c0_41] : memref<1x64x16xf32, #tpu.memory_space<vmem>>, vector<1x64x16xf32>
    %75 = vector.shape_cast %74 : vector<1x64x16xf32> to vector<64x16xf32>
    %cst_42 = arith.constant dense<0.000000e+00> : vector<8x16xf32>
    %76 = tpu.matmul %54, %75, %cst_42 {dimension_numbers = #tpu.dot_dimension_numbers<[1], [0], [0], [1], [0, 0, 1, 1], [], []>} : vector<8x64xf32>, vector<64x16xf32>, vector<8x16xf32> -> vector<8x16xf32>
    %c0_43 = arith.constant 0 : index
    %c0_44 = arith.constant 0 : index
    %77 = vector.load %arg28[%c0_43, %c0_44] : memref<8x16xf32, #tpu.memory_space<vmem>>, vector<8x16xf32>
    tpu.vector_store %arg28[%c0_43, %c0_44], %76 {strides = array<i32>} : memref<8x16xf32, #tpu.memory_space<vmem>>, vector<8x16xf32>,
    %78 = arith.mulf %69, %54 : vector<8x64xf32>
    %c0_45 = arith.constant 0 : index
    %c0_46 = arith.constant 0 : index
    %79 = vector.load %arg26[%c0_45, %c0_46] : memref<8x64xf32, #tpu.memory_space<vmem>>, vector<8x64xf32>
    tpu.vector_store %arg26[%c0_45, %c0_46], %78 {strides = array<i32>} : memref<8x64xf32, #tpu.memory_space<vmem>>, vector<8x64xf32>,
    %c0_47 = arith.constant 0 : index
    %c0_48 = arith.constant 0 : index
    %c0_49 = arith.constant 0 : index
    %80 = vector.load %arg16[%c0_47, %c0_48, %c0_49] : memref<1x16x64xf32, #tpu.memory_space<vmem>>, vector<1x16x64xf32>
    %81 = vector.shape_cast %80 : vector<1x16x64xf32> to vector<16x64xf32>
    %cst_50 = arith.constant 0.000000e+00 : f32
    %82 = vector.broadcast %cst_50 : f32 to vector<1x16x64xf32>
    %83 = vector.shape_cast %69 : vector<8x64xf32> to vector<8x1x64xf32>
    %84 = vector.shape_cast %81 : vector<16x64xf32> to vector<1x16x64xf32>
    %85 = vector.broadcast %83 : vector<8x1x64xf32> to vector<8x16x64xf32>
    %86 = vector.broadcast %84 : vector<1x16x64xf32> to vector<8x16x64xf32>
    %87 = arith.mulf %85, %86 : vector<8x16x64xf32>
    %88 = math.exp %87 : vector<8x16x64xf32>
    %c0_51 = arith.constant 0 : index
    %c0_52 = arith.constant 0 : index
    %c0_53 = arith.constant 0 : index
    %89 = vector.load %arg29[%c0_51, %c0_52, %c0_53] : memref<8x16x64xf32, #tpu.memory_space<vmem>>, vector<8x16x64xf32>
    tpu.vector_store %arg29[%c0_51, %c0_52, %c0_53], %88 {strides = array<i32>} : memref<8x16x64xf32, #tpu.memory_space<vmem>>, vector<8x16x64xf32>,
    %c0_i32_54 = arith.constant 0 : i32
    %c8_i32 = arith.constant 8 : i32
    %90 = arith.addi %c0_i32_54, %c8_i32 : i32
    %c1_i32_55 = arith.constant 1 : i32
    %91 = scf.for %arg30 = %c0_i32_54 to %90 step %c1_i32_55 iter_args(%arg31 = %82) -> (vector<1x16x64xf32>)  : i32 {
      %c1_i32_73 = arith.constant 1 : i32
      %115 = arith.muli %arg30, %c1_i32_73 : i32
      %c0_i32_74 = arith.constant 0 : i32
      %116 = arith.addi %c0_i32_74, %arg30 : i32
      %c1_i32_75 = arith.constant 1 : i32
      %117 = arith.muli %116, %c1_i32_75 : i32
      %118 = arith.index_cast %117 : i32 to index
      %c0_76 = arith.constant 0 : index
      %119 = vector.load %arg27[%118, %c0_76] : memref<8x16xf32, #tpu.memory_space<vmem>>, vector<1x16xf32>
      %120 = arith.index_cast %117 : i32 to index
      %c0_77 = arith.constant 0 : index
      %121 = vector.load %arg26[%120, %c0_77] : memref<8x64xf32, #tpu.memory_space<vmem>>, vector<1x64xf32>
      %122 = arith.index_cast %117 : i32 to index
      %c0_78 = arith.constant 0 : index
      %123 = vector.load %arg28[%122, %c0_78] : memref<8x16xf32, #tpu.memory_space<vmem>>, vector<1x16xf32>
      %124 = arith.index_cast %115 : i32 to index
      %c0_79 = arith.constant 0 : index
      %c0_80 = arith.constant 0 : index
      %125 = vector.load %arg29[%124, %c0_79, %c0_80] : memref<8x16x64xf32, #tpu.memory_space<vmem>>, vector<1x16x64xf32>
      %126 = arith.mulf %125, %arg31 : vector<1x16x64xf32>
      %127 = vector.shape_cast %119 : vector<1x16xf32> to vector<1x16x1xf32>
      %128 = vector.shape_cast %121 : vector<1x64xf32> to vector<1x1x64xf32>
      %129 = vector.broadcast %127 : vector<1x16x1xf32> to vector<1x16x64xf32>
      %130 = vector.broadcast %128 : vector<1x1x64xf32> to vector<1x16x64xf32>
      %131 = arith.mulf %129, %130 : vector<1x16x64xf32>
      %132 = arith.addf %126, %131 : vector<1x16x64xf32>
      %133 = vector.shape_cast %123 : vector<1x16xf32> to vector<1x16x1xf32>
      %134 = vector.broadcast %133 : vector<1x16x1xf32> to vector<1x16x64xf32>
      %135 = arith.mulf %134, %132 : vector<1x16x64xf32>
      %cst_81 = arith.constant dense<0.000000e+00> : vector<1x64xf32>
      %136 = vector.multi_reduction <add>, %135, %cst_81 [1] : vector<1x16x64xf32> to vector<1x64xf32>
      %137 = arith.index_cast %117 : i32 to index
      %c0_82 = arith.constant 0 : index
      %138 = vector.load %arg25[%137, %c0_82] : memref<8x64xf32, #tpu.memory_space<vmem>>, vector<1x64xf32>
      tpu.vector_store %arg25[%137, %c0_82], %136 {strides = array<i32>} : memref<8x64xf32, #tpu.memory_space<vmem>>, vector<1x64xf32>,
      scf.yield %132 : vector<1x16x64xf32>
    }
    %c8_i32_56 = arith.constant 8 : i32
    %c0_57 = arith.constant 0 : index
    %c0_58 = arith.constant 0 : index
    %92 = vector.load %arg25[%c0_57, %c0_58] : memref<8x64xf32, #tpu.memory_space<vmem>>, vector<8x64xf32>
    %c0_59 = arith.constant 0 : index
    %c0_60 = arith.constant 0 : index
    %c0_61 = arith.constant 0 : index
    %93 = vector.load %arg17[%c0_59, %c0_60, %c0_61] : memref<1x1x64xf32, #tpu.memory_space<vmem>>, vector<1x1x64xf32>
    %94 = vector.shape_cast %93 : vector<1x1x64xf32> to vector<1x64xf32>
    %95 = vector.broadcast %94 : vector<1x64xf32> to vector<8x64xf32>
    %96 = arith.mulf %95, %54 : vector<8x64xf32>
    %97 = arith.addf %92, %96 : vector<8x64xf32>
    %cst_62 = arith.constant 0.000000e+00 : f32
    %98 = vector.broadcast %cst_62 : f32 to vector<8x64xf32>
    %99 = arith.subf %98, %9 : vector<8x64xf32>
    %100 = math.exp %99 : vector<8x64xf32>
    %cst_63 = arith.constant 1.000000e+00 : f32
    %101 = vector.broadcast %cst_63 : f32 to vector<8x64xf32>
    %102 = arith.addf %101, %100 : vector<8x64xf32>
    %cst_64 = arith.constant 1.000000e+00 : f32
    %103 = vector.broadcast %cst_64 : f32 to vector<8x64xf32>
    %104 = arith.divf %103, %102 : vector<8x64xf32>
    %105 = arith.mulf %9, %104 : vector<8x64xf32>
    %106 = arith.mulf %97, %105 : vector<8x64xf32>
    %c0_65 = arith.constant 0 : index
    %c0_66 = arith.constant 0 : index
    %c0_67 = arith.constant 0 : index
    %107 = vector.load %arg18[%c0_65, %c0_66, %c0_67] : memref<1x64x32xf32, #tpu.memory_space<vmem>>, vector<1x64x32xf32>
    %108 = vector.shape_cast %107 : vector<1x64x32xf32> to vector<64x32xf32>
    %cst_68 = arith.constant dense<0.000000e+00> : vector<8x32xf32>
    %109 = tpu.matmul %106, %108, %cst_68 {dimension_numbers = #tpu.dot_dimension_numbers<[1], [0], [0], [1], [0, 0, 1, 1], [], []>} : vector<8x64xf32>, vector<64x32xf32>, vector<8x32xf32> -> vector<8x32xf32>
    %110 = arith.addf %3, %109 : vector<8x32xf32>
    %c0_69 = arith.constant 0 : index
    %c0_70 = arith.constant 0 : index
    %111 = vector.load %arg24[%c0_69, %c0_70] : memref<8x32xf32, #tpu.memory_space<vmem>>, vector<8x32xf32>
    tpu.vector_store %arg24[%c0_69, %c0_70], %110 {strides = array<i32>} : memref<8x32xf32, #tpu.memory_space<vmem>>, vector<8x32xf32>,
    %c1_i32_71 = arith.constant 1 : i32
    %112 = arith.cmpi eq, %arg1, %c1_i32_71 : i32
    %113 = arith.extui %112 : i1 to i32
    %c0_i32_72 = arith.constant 0 : i32
    %114 = arith.cmpi ne, %113, %c0_i32_72 : i32
    scf.if %114 {
      %c0_73 = arith.constant 0 : index
      %c0_74 = arith.constant 0 : index
      %115 = vector.load %arg19[%c0_73, %c0_74] : memref<1x32xf32, #tpu.memory_space<vmem>>, vector<1x32xf32>
      %c0_75 = arith.constant 0 : index
      %c0_76 = arith.constant 0 : index
      %116 = vector.load %arg20[%c0_75, %c0_76] : memref<1x32xf32, #tpu.memory_space<vmem>>, vector<1x32xf32>
      %cst_77 = arith.constant dense<0.000000e+00> : vector<8xf32>
      %117 = vector.multi_reduction <add>, %110, %cst_77 [1] : vector<8x32xf32> to vector<8xf32>
      %118 = vector.shape_cast %117 : vector<8xf32> to vector<8x1xf32>
      %cst_78 = arith.constant 3.200000e+01 : f32
      %119 = vector.broadcast %cst_78 : f32 to vector<8x1xf32>
      %120 = arith.divf %118, %119 : vector<8x1xf32>
      %121 = vector.broadcast %120 : vector<8x1xf32> to vector<8x32xf32>
      %122 = arith.subf %110, %121 : vector<8x32xf32>
      %123 = arith.mulf %122, %122 : vector<8x32xf32>
      %cst_79 = arith.constant dense<0.000000e+00> : vector<8xf32>
      %124 = vector.multi_reduction <add>, %123, %cst_79 [1] : vector<8x32xf32> to vector<8xf32>
      %125 = vector.shape_cast %124 : vector<8xf32> to vector<8x1xf32>
      %cst_80 = arith.constant 3.200000e+01 : f32
      %126 = vector.broadcast %cst_80 : f32 to vector<8x1xf32>
      %127 = arith.divf %125, %126 : vector<8x1xf32>
      %cst_81 = arith.constant 9.99999974E-6 : f32
      %128 = vector.broadcast %cst_81 : f32 to vector<8x1xf32>
      %129 = arith.addf %127, %128 : vector<8x1xf32>
      %130 = math.rsqrt %129 : vector<8x1xf32>
      %131 = vector.broadcast %130 : vector<8x1xf32> to vector<8x32xf32>
      %132 = arith.mulf %122, %131 : vector<8x32xf32>
      %133 = vector.broadcast %115 : vector<1x32xf32> to vector<8x32xf32>
      %134 = arith.mulf %132, %133 : vector<8x32xf32>
      %135 = vector.broadcast %116 : vector<1x32xf32> to vector<8x32xf32>
      %136 = arith.addf %134, %135 : vector<8x32xf32>
      %137 = vector.extract_strided_slice %136 {offsets = [6, 0], sizes = [2, 32], strides = [1, 1]} : vector<8x32xf32> to vector<2x32xf32>
      %c0_82 = arith.constant 0 : index
      %c0_83 = arith.constant 0 : index
      %138 = vector.load %arg21[%c0_82, %c0_83] : memref<32x32xf32, #tpu.memory_space<vmem>>, vector<32x32xf32>
      %cst_84 = arith.constant dense<0.000000e+00> : vector<2x32xf32>
      %139 = tpu.matmul %137, %138, %cst_84 {dimension_numbers = #tpu.dot_dimension_numbers<[1], [0], [0], [1], [0, 0, 1, 1], [], []>} : vector<2x32xf32>, vector<32x32xf32>, vector<2x32xf32> -> vector<2x32xf32>
      %c0_85 = arith.constant 0 : index
      %c0_86 = arith.constant 0 : index
      %140 = vector.load %arg22[%c0_85, %c0_86] : memref<1x32xf32, #tpu.memory_space<vmem>>, vector<1x32xf32>
      %141 = vector.broadcast %140 : vector<1x32xf32> to vector<2x32xf32>
      %142 = arith.addf %139, %141 : vector<2x32xf32>
      %c0_87 = arith.constant 0 : index
      %c0_88 = arith.constant 0 : index
      %c0_89 = arith.constant 0 : index
      %143 = vector.load %arg23[%c0_87, %c0_88, %c0_89] : memref<1x2x32xf32, #tpu.memory_space<vmem>>, vector<1x2x32xf32>
      %144 = vector.shape_cast %143 : vector<1x2x32xf32> to vector<2x32xf32>
      %145 = vector.shape_cast %142 : vector<2x32xf32> to vector<1x2x32xf32>
      tpu.vector_store %arg23[%c0_87, %c0_88, %c0_89], %145 {strides = array<i32>} : memref<1x2x32xf32, #tpu.memory_space<vmem>>, vector<1x2x32xf32>,
    } else {
    }
    return
  }
  func.func @transform_0(%arg0: i32, %arg1: i32) -> (i32, i32, i32) {
    %c0_i32 = arith.constant 0 : i32
    %c0_i32_0 = arith.constant 0 : i32
    %c0_i32_1 = arith.constant 0 : i32
    return %arg0, %c0_i32, %c0_i32_0 : i32, i32, i32
  }
  func.func @transform_1(%arg0: i32, %arg1: i32) -> (i32, i32, i32) {
    %c0_i32 = arith.constant 0 : i32
    %c0_i32_0 = arith.constant 0 : i32
    %c0_i32_1 = arith.constant 0 : i32
    return %arg0, %c0_i32, %c0_i32_0 : i32, i32, i32
  }
  func.func @transform_2(%arg0: i32, %arg1: i32) -> (i32, i32, i32) {
    %c0_i32 = arith.constant 0 : i32
    %c0_i32_0 = arith.constant 0 : i32
    %c0_i32_1 = arith.constant 0 : i32
    return %arg0, %c0_i32, %c0_i32_0 : i32, i32, i32
  }
  func.func @transform_3(%arg0: i32, %arg1: i32) -> (i32, i32) {
    %c0_i32 = arith.constant 0 : i32
    %c0_i32_0 = arith.constant 0 : i32
    %c0_i32_1 = arith.constant 0 : i32
    return %c0_i32, %c0_i32_0 : i32, i32
  }
  func.func @transform_4(%arg0: i32, %arg1: i32) -> (i32, i32) {
    %c0_i32 = arith.constant 0 : i32
    %c0_i32_0 = arith.constant 0 : i32
    %c0_i32_1 = arith.constant 0 : i32
    return %c0_i32, %c0_i32_0 : i32, i32
  }
  func.func @transform_5(%arg0: i32, %arg1: i32) -> (i32, i32) {
    %c0_i32 = arith.constant 0 : i32
    %c0_i32_0 = arith.constant 0 : i32
    %c0_i32_1 = arith.constant 0 : i32
    return %c0_i32, %c0_i32_0 : i32, i32
  }
  func.func @transform_6(%arg0: i32, %arg1: i32) -> (i32, i32, i32) {
    %c0_i32 = arith.constant 0 : i32
    %c0_i32_0 = arith.constant 0 : i32
    %c0_i32_1 = arith.constant 0 : i32
    return %arg1, %c0_i32, %c0_i32_0 : i32, i32, i32
  }
  func.func @transform_7(%arg0: i32, %arg1: i32) -> (i32, i32, i32) {
    %c0_i32 = arith.constant 0 : i32
    %c0_i32_0 = arith.constant 0 : i32
    %c0_i32_1 = arith.constant 0 : i32
    return %arg1, %c0_i32, %c0_i32_0 : i32, i32, i32
  }
  func.func @transform_8(%arg0: i32, %arg1: i32) -> (i32, i32, i32) {
    %c0_i32 = arith.constant 0 : i32
    %c0_i32_0 = arith.constant 0 : i32
    %c0_i32_1 = arith.constant 0 : i32
    return %arg1, %c0_i32, %c0_i32_0 : i32, i32, i32
  }
  func.func @transform_9(%arg0: i32, %arg1: i32) -> (i32, i32, i32) {
    %c0_i32 = arith.constant 0 : i32
    %c0_i32_0 = arith.constant 0 : i32
    %c0_i32_1 = arith.constant 0 : i32
    return %arg1, %c0_i32, %c0_i32_0 : i32, i32, i32
  }
  func.func @transform_10(%arg0: i32, %arg1: i32) -> (i32, i32, i32) {
    %c0_i32 = arith.constant 0 : i32
    %c0_i32_0 = arith.constant 0 : i32
    %c0_i32_1 = arith.constant 0 : i32
    return %arg1, %c0_i32, %c0_i32_0 : i32, i32, i32
  }
  func.func @transform_11(%arg0: i32, %arg1: i32) -> (i32, i32, i32) {
    %c0_i32 = arith.constant 0 : i32
    %c0_i32_0 = arith.constant 0 : i32
    %c0_i32_1 = arith.constant 0 : i32
    return %arg1, %c0_i32, %c0_i32_0 : i32, i32, i32
  }
  func.func @transform_12(%arg0: i32, %arg1: i32) -> (i32, i32, i32) {
    %c0_i32 = arith.constant 0 : i32
    %c0_i32_0 = arith.constant 0 : i32
    %c0_i32_1 = arith.constant 0 : i32
    return %arg1, %c0_i32, %c0_i32_0 : i32, i32, i32
  }
  func.func @transform_13(%arg0: i32, %arg1: i32) -> (i32, i32, i32) {
    %c0_i32 = arith.constant 0 : i32
    %c0_i32_0 = arith.constant 0 : i32
    %c0_i32_1 = arith.constant 0 : i32
    return %arg1, %c0_i32, %c0_i32_0 : i32, i32, i32
  }
  func.func @transform_14(%arg0: i32, %arg1: i32) -> (i32, i32, i32) {
    %c0_i32 = arith.constant 0 : i32
    %c0_i32_0 = arith.constant 0 : i32
    %c0_i32_1 = arith.constant 0 : i32
    return %arg1, %c0_i32, %c0_i32_0 : i32, i32, i32
  }
  func.func @transform_15(%arg0: i32, %arg1: i32) -> (i32, i32, i32) {
    %c0_i32 = arith.constant 0 : i32
    %c0_i32_0 = arith.constant 0 : i32
    %c0_i32_1 = arith.constant 0 : i32
    return %arg1, %c0_i32, %c0_i32_0 : i32, i32, i32
  }
  func.func @transform_16(%arg0: i32, %arg1: i32) -> (i32, i32, i32) {
    %c0_i32 = arith.constant 0 : i32
    %c0_i32_0 = arith.constant 0 : i32
    %c0_i32_1 = arith.constant 0 : i32
    return %arg1, %c0_i32, %c0_i32_0 : i32, i32, i32
  }
  func.func @transform_17(%arg0: i32, %arg1: i32) -> (i32, i32) {
    %c0_i32 = arith.constant 0 : i32
    %c0_i32_0 = arith.constant 0 : i32
    %c0_i32_1 = arith.constant 0 : i32
    return %c0_i32, %c0_i32_0 : i32, i32
  }
  func.func @transform_18(%arg0: i32, %arg1: i32) -> (i32, i32) {
    %c0_i32 = arith.constant 0 : i32
    %c0_i32_0 = arith.constant 0 : i32
    %c0_i32_1 = arith.constant 0 : i32
    return %c0_i32, %c0_i32_0 : i32, i32
  }
  func.func @transform_19(%arg0: i32, %arg1: i32) -> (i32, i32) {
    %c0_i32 = arith.constant 0 : i32
    %c0_i32_0 = arith.constant 0 : i32
    %c0_i32_1 = arith.constant 0 : i32
    return %c0_i32, %c0_i32_0 : i32, i32
  }
  func.func @transform_20(%arg0: i32, %arg1: i32) -> (i32, i32) {
    %c0_i32 = arith.constant 0 : i32
    %c0_i32_0 = arith.constant 0 : i32
    %c0_i32_1 = arith.constant 0 : i32
    return %c0_i32, %c0_i32_0 : i32, i32
  }
  func.func @transform_21(%arg0: i32, %arg1: i32) -> (i32, i32, i32) {
    %c0_i32 = arith.constant 0 : i32
    %c0_i32_0 = arith.constant 0 : i32
    %c0_i32_1 = arith.constant 0 : i32
    return %arg0, %c0_i32, %c0_i32_0 : i32, i32, i32
  }
}

</mosaic_0001>

<bundles_post_ra>
// kernel: tpu_custom_call.1
= control target key start
LH: loop header
LB: loop body
LE: loop exit
PB: predicated region body
PF: predicated region fallthrough
CT: control target
= control target key end

     0   :  { %s2537_s0 = inlined_call_operand.vmem [shape: f32[2,6,32], index: 0, kind: input, shape index: {}]   ;;  %s2538_s1 = inlined_call_operand.vmem [shape: f32[2,2,32], index: 1, kind: input, shape index: {}]   ;;  %s2539_s2 = inlined_call_operand.vmem [shape: f32[2,2,32], index: 2, kind: input, shape index: {}]   ;;  %s2540_s3 = inlined_call_operand.vmem [shape: f32[32,32], index: 3, kind: input, shape index: {}]   ;;  %s2541_s4 = inlined_call_operand.vmem [shape: f32[32,32], index: 4, kind: input, shape index: {}]   ;;  %s2542_s5 = inlined_call_operand.vmem [shape: f32[1,32], index: 5, kind: input, shape index: {}]   ;;  %s2543_s6 = inlined_call_operand.vmem [shape: f32[2,32,64], index: 6, kind: input, shape index: {}]   ;;  %s2544_s7 = inlined_call_operand.vmem [shape: f32[2,32,64], index: 7, kind: input, shape index: {}]   ;;  %s2545_s8 = inlined_call_operand.vmem [shape: f32[2,4,64], index: 8, kind: input, shape index: {}]   ;;  %s2546_s9 = inlined_call_operand.vmem [shape: f32[2,1,64], index: 9, kind: input, shape index: {}]   ;;  %s2547_s10 = inlined_call_operand.vmem [shape: f32[2,64,64], index: 10, kind: input, shape index: {}]   ;;  %s2548_s11 = inlined_call_operand.vmem [shape: f32[2,1,64], index: 11, kind: input, shape index: {}]   ;;  %s2549_s12 = inlined_call_operand.vmem [shape: f32[2,64,16], index: 12, kind: input, shape index: {}]   ;;  %s2550_s13 = inlined_call_operand.vmem [shape: f32[2,64,16], index: 13, kind: input, shape index: {}]   ;;  %s2551_s14 = inlined_call_operand.vmem [shape: f32[2,16,64], index: 14, kind: input, shape index: {}]   ;;  %s2552_s15 = inlined_call_operand.vmem [shape: f32[2,1,64], index: 15, kind: input, shape index: {}]   ;;  %s2553_s16 = inlined_call_operand.vmem [shape: f32[2,64,32], index: 16, kind: input, shape index: {}]   ;;  %s2554_s17 = inlined_call_operand.vmem [shape: f32[1,32], index: 17, kind: input, shape index: {}]   ;;  %s2555_s18 = inlined_call_operand.vmem [shape: f32[1,32], index: 18, kind: input, shape index: {}]   ;;  %s2556_s19 = inlined_call_operand.vmem [shape: f32[32,32], index: 19, kind: input, shape index: {}]   ;;  %s2557_s20 = inlined_call_operand.vmem [shape: f32[1,32], index: 20, kind: input, shape index: {}]   ;;  %s2558_s21 = inlined_call_operand.hbm [shape: f32[2,2,32], index: 21, kind: output, shape index: {}]  }
   0x1   :  { %2577 = sst [smem:[#allocation25_spill]] %s2537_s0 }
   0x2   :  { %2578 = sst [smem:[#allocation26_spill]] %s2538_s1 }
   0x3   :  { %2579 = sst [smem:[#allocation27_spill]] %s2539_s2 }
   0x4   :  { %2580 = sst [smem:[#allocation28_spill]] %s2540_s3 }
   0x5   :  { %2581 = sst [smem:[#allocation29_spill]] %s2541_s4 }
   0x6   :  { %2582 = sst [smem:[#allocation30_spill]] %s2542_s5 }
   0x7   :  { %2583 = sst [smem:[#allocation31_spill]] %s2543_s6 }
   0x8   :  { %2584 = sst [smem:[#allocation32_spill]] %s2544_s7 }
   0x9   :  { %2585 = sst [smem:[#allocation33_spill]] %s2545_s8 }
   0xa   :  { %2586 = sst [smem:[#allocation34_spill]] %s2547_s10 }
   0xb   :  { %2587 = sst [smem:[#allocation35_spill]] %s2549_s12 }
   0xc   :  { %2588 = sst [smem:[#allocation36_spill]] %s2550_s13 }
   0xd   :  { %2589 = sst [smem:[#allocation37_spill]] %s2552_s15 }
   0xe   :  { %2590 = sst [smem:[#allocation38_spill]] %s2554_s17 }
   0xf   :  { %2591 = sst [smem:[#allocation39_spill]] %s2555_s18 }
  0x10   :  { %2592 = sst [smem:[#allocation40_spill]] %s2556_s19 }
  0x11   :  { %2593 = sst [smem:[#allocation41_spill]] %s2557_s20 }
  0x12   :  { %2594 = sst [smem:[#allocation42_spill]] %s2558_s21 }
  0x13   :  { %26 = vsyncpa [#allocation9], 0 }
  0x14   :  { %28 = vsyncpa [#allocation9 + $0x1], 0  ;;  %s2160_s2 = smov 0   ;;  %s2162_s25 = smov 0  }
  0x15   :  { %s2164_s26 = smov 0   ;;  %s2166_s27 = smov 0  }
  0x16   :  { %s2168_s3 = smov 0   ;;  %s2170_s28 = smov 0  }
  0x17   :  { %s2172_s29 = smov 0   ;;  %s2174_s0 = smov 0  }
  0x18 LB: > { %2595 = sst [smem:[#allocation11_spill]] %s2007_s2  ;;  %s1724_s4 = sadd.s32 4294967295, %s2035_s0   ;;  %s2035_s0 = sphi %s2174_s0, %s34_s0   ;;  %s2031_s29 = sphi %s2172_s29, %s2652_s29   ;;  %s2027_s28 = sphi %s2170_s28, %s2651_s28   ;;  %s2023_s3 = sphi %s2168_s3, %s2650_s3   ;;  %s2019_s27 = sphi %s2166_s27, %s2649_s27   ;;  %s2015_s26 = sphi %s2164_s26, %s2648_s26   ;;  %s2011_s25 = sphi %s2162_s25, %s2647_s25   ;;  %s2007_s2 = sphi %s2160_s2, %s2646_s2  }
  0x19   : > { %2596 = sst [smem:[#allocation12_spill]] %s2011_s25  ;;  %s1725_s30 = sadd.s32 4294967294, %s2035_s0  }
  0x1a   : > { %2597 = sst [smem:[#allocation13_spill]] %s2015_s26  ;;  %s43_s5 = sadd.s32 1, %s2027_s28 }
  0x1b   : > { %2598 = sst [smem:[#allocation14_spill]] %s2019_s27  ;;  %p44_p0 = scmp.ge.s32.totalorder %s43_s5, 2 }
  0x1c   : > { %2599 = sst [smem:[#allocation15_spill]] %s2023_s3  ;;  %s46_s22 = sadd.s32 1, %s2031_s29 }
  0x1d   : > { %2600 = sst [smem:[#allocation16_spill]] %s2027_s28  ;;  %p574_p1 = scmp.ne.s32.totalorder %s2015_s26, %s2011_s25 }
  0x1e   : > { %2601 = sst [smem:[#allocation17_spill]] %s2031_s29  ;;  %p575_p2 = scmp.eq.s32.totalorder %s1724_s4, 3 }
  0x1f   : > { %2602 = sst [smem:[#allocation18_spill]] %s2035_s0  ;;  %s2654_s5 = smov (%p44_p0, %s43_s5), 0 }
  0x20   : > { %2603 = sst [smem:[#allocation19_spill]] %s2654_s5  ;;  %s2656_s22 = smov (!%p44_p0, %s46_s22), %s2031_s29 }
  0x21   : > { %p2209_p3 = por %p575_p2, %p574_p1  ;;  %p580_p4 = scmp.ne.s32.totalorder %s2011_s25, %s2007_s2 }
  0x22   : > { %p48_p5 = scmp.ge.s32.totalorder %s2656_s22, 2  ;;  %p581_p6 = scmp.eq.s32.totalorder %s1725_s30, 3 }
  0x23   : > { %s2604_s23 = scalar_select %p2209_p3, 1, 0 }
  0x24   : > { %p1728_p7 = scmp.ge.s32.totalorder %s2035_s0, 1  ;;  %p722_p8 = scmp.lt.s32.totalorder %s2035_s0, 5 }
  0x25   : > { %2605 = sst [smem:[#allocation20_spill]] %s2604_s23  ;;  %s2658_s22 = smov (%p48_p5, %s2656_s22), 0 }
  0x26   : > { %2606 = sst [smem:[#allocation21_spill]] %s2658_s22  ;;  %p2219_p9 = por %p581_p6, %p580_p4 }
  0x27   : > { %p723_p10 = pnand %p1728_p7, %p722_p8  ;;  %s561_s24 = ssub.s32 %s2031_s29, %s2658_s22 }
  0x28   : > { %s2607_s1 = scalar_select %p2219_p9, 1, 0 }
  0x29   : > { %s564_s4 = sadd.s32 1, %s2015_s26  ;;  %p562_p11 = scmp.eq.s32.totalorder %s561_s24, 0 }
  0x2a   : > { %2608 = sst [smem:[#allocation22_spill]] %s2607_s1  ;;  %726 = sbr.rel (%p723_p10) target bundleno = 1312 (0x520), region = 104 }
  0x2b   : > { %s2227_s5 = scalar_select %p562_p11, %s2015_s26, %s564_s4  }
  0x2d   : > { %2609 = sst [smem:[#allocation23_spill]] %s2227_s5 }
  0x2f   : > { %s2567_s30 = sand.u32 1, %s2011_s25   ;;  %p837_p12 = scmp.lt.s32.totalorder %s2023_s3, 1 }
  0x30   : > { %s2233_s28 = sshll.u32 %s2567_s30, 1  ;;  %p849_p13 = scmp.lt.s32.totalorder %s2019_s27, 1 }
  0x31   : > { %s838_s1 = scalar_select %p837_p12, %s2023_s3, 1 }
  0x32   : > { %s2238_s2 = scalar_select %p849_p13, %s2019_s27, 1 }
  0x33   : > { %s1730_s24 = sshll.u32 %s838_s1, 3  ;;  %s1731_s4 = sshll.u32 %s838_s1, 1 }
  0x34   : > { %s2610_s5 = sld [smem:[#allocation25_spill]]  ;;  %s1764_s17 = sshll.u32 %s2238_s2, 5 }
  0x35   : > { %s2612_s21 = sld [smem:[#allocation26_spill]]  ;;  %s1737_s0 = sshll.u32 %s2238_s2, 2 }
  0x36   : > { %s2613_s20 = sld [smem:[#allocation27_spill]]  ;;  %s1769_s25 = sshll.u32 %s2238_s2, 4 }
  0x37   : > { %s2614_s6 = sld [smem:[#allocation31_spill]] }
  0x38   : > { %s2615_s7 = sld [smem:[#allocation32_spill]] }
  0x39   : > { %s2616_s8 = sld [smem:[#allocation33_spill]] }
  0x3a   : > { %s2243_s26 = scalar_lea.vmem %s2610_s5, %s1730_s24  ;;  %s2617_s10 = sld [smem:[#allocation34_spill]] }
  0x3b   : > { %2611 = sst [smem:[#allocation24_spill]] %s2243_s26  ;;  %s2248_s23 = scalar_lea.vmem %s2612_s21, %s1731_s4 }
  0x3c   : > { %s2253_s18 = scalar_lea.vmem %s2613_s20, %s1731_s4  ;;  %s1766_s4 = sshll.u32 %s2238_s2, 6 }
  0x3d   : > { %s2259_s27 = scalar_lea.vmem %s2614_s6, %s1764_s17  ;;  %s2618_s12 = sld [smem:[#allocation35_spill]] }
  0x3e   : > { %s2264_s22 = scalar_lea.vmem %s2615_s7, %s1764_s17  ;;  %s2619_s13 = sld [smem:[#allocation36_spill]] }
  0x3f   : > { %s2274_s3 = scalar_lea.vmem %s2616_s8, %s1737_s0  ;;  %s2304_s6 = scalar_lea.vmem %s2551_s14, %s1769_s25 }
  0x40   : > { %s2280_s1 = scalar_lea.vmem %s2617_s10, %s1766_s4  ;;  %s2309_s7 = scalar_lea.vmem %s2553_s16, %s1766_s4 }
  0x41   : > { %s836_s5 = scalar_lea.vmem [#allocation8], %s2233_s28 }
  0x43   : > { %s2289_s21 = scalar_lea.vmem %s2618_s12, %s1766_s4  ;;  %s2621_s12 = sld [smem:[#allocation14_spill]] }
  0x44   : > { %s2294_s0 = scalar_lea.vmem %s2619_s13, %s1766_s4 }
  0x49   : > { %p1748_p0 = scmp.ne.s32.totalorder %s2621_s12, 0 }
  0x4a   : > { %s2622_s13 = sld [smem:[#allocation29_spill]] (!%p1748_p0) }
  0x4b   : > { %900 = sbr.rel (%p1748_p0) target bundleno = 220 (0xdc), region = 108  ;;  %s2623_s26 = sld [smem:[#allocation28_spill]] (!%p1748_p0) }
  0x4c   : > { %s2625_s29 = sld [smem:[#allocation24_spill]] (!%p1748_p0) }
  0x4d   : > { %s2626_s17 = sld [smem:[#allocation30_spill]] (!%p1748_p0) }
  0x50   : > { %v910_v0 = vld [vmem:[%s2622_s13 + $0x18] sm:$0xff]  ;;  %v909_v2 = vld [vmem:[%s2622_s13 + $0x10] sm:$0xff]  ;;  %v908_v4 = vld [vmem:[%s2622_s13 + $0x8] sm:$0xff]  ;;  %vm911_vm0 = vcmask 261120   ;;  %vm964_vm1 = vcmask 259072   ;;  %vm966_vm2 = vcmask 254976  }
  0x51   : > { %s2624_s15 = smov %s2623_s26  ;;  %v905_v1 = vld [vmem:[%s2623_s26 + $0x18] sm:$0xff]  ;;  %927 = vmatpush.msra.mxu0 %v910_v0  ;;  %v907_v6 = vld [vmem:[%s2622_s13] sm:$0xff] }
  0x52   : > { %950 = vmatpush.msra.mxu1 %v905_v1  ;;  %v904_v3 = vld [vmem:[%s2624_s15 + $0x10] sm:$0xff]  ;;  %v903_v5 = vld [vmem:[%s2624_s15 + $0x8] sm:$0xff]  ;;  %v902_v7 = vld [vmem:[%s2624_s15] sm:$0xff] }
  0x53   : > { %928 = vmatpush.msra.mxu0 %v909_v2  ;;  %v906_v8 = vld [vmem:[%s2253_s18] sm:$0x3] }
  0x54   : > { %951 = vmatpush.msra.mxu1 %v904_v3  ;;  %v901_v9 = vld [vmem:[%s2248_s23] sm:$0x3] }
  0x55   : > { %929 = vmatpush.msra.mxu0 %v908_v4  ;;  %v963_v10 = vld [vmem:[%s2625_s29] sm:$0x3f] }
  0x56   : > { %952 = vmatpush.msra.mxu1 %v903_v5  ;;  %965 = vst.msk [vmem:[#allocation2] sm:$0x3f] %vm964_vm1, %v963_v10  ;;  %v1867_v11 = vld [vmem:[%s2626_s17] ss:$0 sm:$0xff] }
  0x57   : > { %930 = vmatpush.msra.mxu0 %v907_v6 }
  0x58   : > { %953 = vmatpush.msra.mxu1 %v902_v7  ;;  %1749 = vmatmul.msk.f32.vlgmr.msra.gmra.mxu0 %vm911_vm0, %v906_v8 }
  0x59   : > { %1750 = vmatmul.msk.f32.vlgmr.msra.gmra.mxu1 %vm911_vm0, %v901_v9 }
  0xd5   : > { %v932_v12 = vpop.f32.mrf.mxu0 }
  0xd6   : > { %v955_v13 = vpop.f32.mrf.mxu1 }
  0xd7   : > { %v956_v14 = vadd.f32 %v955_v13, %v932_v12 }
  0xd9   : > { %v962_v15 = vadd.f32 %v1867_v11, %v956_v14 }
  0xdb   : > { %967 = vst.msk [vmem:[#allocation2 + $0x6] sm:$0x3] %vm966_vm2, %v962_v15 }
  0xdc PF: > { %v972_v16 = vld [vmem:[%s2259_s27 + $0x18] sm:$0xff]  ;;  %v971_v17 = vld [vmem:[%s2259_s27 + $0x10] sm:$0xff]  ;;  %v970_v18 = vld [vmem:[%s2259_s27 + $0x8] sm:$0xff]  ;;  %vm973_vm3 = vcmask 261120   ;;  %v1022_v45 = vlaneseq  ;;  %s2627_s23 = scalar_lea.vmem %s2546_s9, %s2238_s2  ;;  %vm1081_vm11 = vcmask 523264   ;;  %vm1148_vm12 = vcmask 130048  }
  0xdd   : > { %989 = vmatpush.msra.mxu0 %v972_v16  ;;  %v969_v19 = vld [vmem:[%s2259_s27] sm:$0xff]  ;;  %v1076_v21 = vld [vmem:[%s2280_s1 + $0x38] sm:$0xff]  ;;  %v1075_v24 = vld [vmem:[%s2280_s1 + $0x30] sm:$0xff] }
  0xde   : > { %v1127_v22 = vld [vmem:[%s2289_s21 + $0x38] sm:$0xff]  ;;  %1093 = vmatpush.msra.mxu2 %v1076_v21  ;;  %v1126_v25 = vld [vmem:[%s2289_s21 + $0x30] sm:$0xff]  ;;  %v1074_v27 = vld [vmem:[%s2280_s1 + $0x28] sm:$0xff]  ;;  %v2375_v46 = vshrl.u32 %v1022_v45, 7 }
  0xdf   : > { %990 = vmatpush.msra.mxu0 %v971_v17  ;;  %v1157_v23 = vld [vmem:[%s2294_s0 + $0x38] sm:$0xff]  ;;  %1136 = vmatpush.msra.mxu3 %v1127_v22  ;;  %v1156_v26 = vld [vmem:[%s2294_s0 + $0x30] sm:$0xff]  ;;  %v1125_v28 = vld [vmem:[%s2289_s21 + $0x28] sm:$0xff] }
  0xe0   : > { %1094 = vmatpush.msra.mxu2 %v1075_v24  ;;  %v1155_v29 = vld [vmem:[%s2294_s0 + $0x28] sm:$0xff]  ;;  %v1073_v30 = vld [vmem:[%s2280_s1 + $0x20] sm:$0xff]  ;;  %v1072_v33 = vld [vmem:[%s2280_s1 + $0x18] sm:$0xff]  ;;  %vm1027_vm4 = vcmp.ge.s32.totalorder %v2375_v46, 1  ;;  %vm1033_vm5 = vcmp.ge.s32.totalorder %v2375_v46, 2  ;;  %vm1039_vm6 = vcmp.ge.s32.totalorder %v2375_v46, 3 }
  0xe1   : > { %991 = vmatpush.msra.mxu0 %v970_v18  ;;  %1137 = vmatpush.msra.mxu3 %v1126_v25  ;;  %v1124_v31 = vld [vmem:[%s2289_s21 + $0x20] sm:$0xff]  ;;  %v1123_v34 = vld [vmem:[%s2289_s21 + $0x18] sm:$0xff]  ;;  %v1071_v36 = vld [vmem:[%s2280_s1 + $0x10] sm:$0xff] }
  0xe2   : > { %v2347_v20 = vld [vmem:[#allocation2] sm:$0xff]  ;;  %1095 = vmatpush.msra.mxu2 %v1074_v27  ;;  %v1153_v35 = vld [vmem:[%s2294_s0 + $0x18] sm:$0xff]  ;;  %v1122_v37 = vld [vmem:[%s2289_s21 + $0x10] sm:$0xff] }
  0xe3   : > { %992 = vmatpush.msra.mxu0 %v969_v19  ;;  %1138 = vmatpush.msra.mxu3 %v1125_v28  ;;  %v1154_v32 = vld [vmem:[%s2294_s0 + $0x20] sm:$0xff]  ;;  %v1152_v38 = vld [vmem:[%s2294_s0 + $0x10] sm:$0xff]  ;;  %v1070_v39 = vld [vmem:[%s2280_s1 + $0x8] sm:$0xff] }
  0xe4   : > { %1751 = vmatmul.msk.f32.vlgmr.msra.gmra.mxu0 %vm973_vm3, %v2347_v20  ;;  %1096 = vmatpush.msra.mxu2 %v1073_v30  ;;  %v1121_v40 = vld [vmem:[%s2289_s21 + $0x8] sm:$0xff]  ;;  %v1069_v42 = vld [vmem:[%s2280_s1] sm:$0xff]  ;;  %v1000_v5 = vld [vmem:[%s2264_s22 + $0x18] sm:$0xff]  ;;  %s2628_s1 = scalar_lea.vmem %s2548_s11, %s2238_s2 }
  0xe5   : > { %1166 = vmatpush.msrb.mxu0 %v1157_v23  ;;  %1139 = vmatpush.msra.mxu3 %v1124_v31  ;;  %v1151_v41 = vld [vmem:[%s2294_s0 + $0x8] sm:$0xff]  ;;  %v1120_v43 = vld [vmem:[%s2289_s21] sm:$0xff]  ;;  %v999_v6 = vld [vmem:[%s2264_s22 + $0x10] sm:$0xff]  ;;  %s2427_s21 = smov 0  }
  0xe6   : > { %1097 = vmatpush.msra.mxu2 %v1072_v33  ;;  %v1150_v44 = vld [vmem:[%s2294_s0] sm:$0xff]  ;;  %1013 = vmatpush.msra.mxu1 %v1000_v5  ;;  %v998_v8 = vld [vmem:[%s2264_s22 + $0x8] sm:$0xff] }
  0xe7   : > { %1167 = vmatpush.msrb.mxu0 %v1156_v26  ;;  %1140 = vmatpush.msra.mxu3 %v1123_v34  ;;  %v1021_v47 = vld [vmem:[%s2274_s3] sm:$0xf] }
  0xe8   : > { %1098 = vmatpush.msra.mxu2 %v1071_v36  ;;  %v1024_v49 = vperm.slane %v1021_v47, 3  ;;  %v1029_v50 = vperm.slane %v1021_v47, 2  ;;  %v1035_v54 = vperm.slane %v1021_v47, 1  ;;  %v1041_v59 = vperm.slane %v1021_v47, 0  ;;  %v1868_v1 = vld [vmem:[%s2627_s23] ss:$0 sm:$0xff]  ;;  %1014 = vmatpush.msra.mxu1 %v999_v6 }
  0xe9   : > { %1168 = vmatpush.msrb.mxu0 %v1155_v29  ;;  %1141 = vmatpush.msra.mxu3 %v1122_v37  ;;  %v997_v9 = vld [vmem:[%s2264_s22] sm:$0xff] }
  0xea   : > { %1099 = vmatpush.msra.mxu2 %v1070_v39  ;;  %1015 = vmatpush.msra.mxu1 %v998_v8  ;;  %v1869_v25 = vld [vmem:[%s2628_s1] ss:$0 sm:$0xff] }
  0xeb   : > { %1169 = vmatpush.msrb.mxu0 %v1154_v32  ;;  %1142 = vmatpush.msra.mxu3 %v1121_v40 }
  0xec   : > { %1100 = vmatpush.msra.mxu2 %v1069_v42  ;;  %1016 = vmatpush.msra.mxu1 %v997_v9 }
  0xed   : > { %1170 = vmatpush.msrb.mxu0 %v1153_v35  ;;  %1143 = vmatpush.msra.mxu3 %v1120_v43 }
  0xee   : > { %1752 = vmatmul.msk.f32.vlgmr.msra.gmra.mxu1 %vm973_vm3, %v2347_v20 }
  0xef   : > { %1171 = vmatpush.msrb.mxu0 %v1152_v38 }
  0xf1   : > { %1172 = vmatpush.msrb.mxu0 %v1151_v41 }
  0xf3   : > { %1173 = vmatpush.msrb.mxu0 %v1150_v44 }
 0x161   : > { %v994_v48 = vpop.f32.mrf.mxu0 }
 0x162   : > { %v1026_v51 = vrot.slane %v994_v48, 7  ;;  %v1032_v52 = vrot.slane %v994_v48, 6  ;;  %v1038_v53 = vrot.slane %v994_v48, 5  ;;  %v1025_v57 = vmul.f32 %v1024_v49, %v994_v48  ;;  %v1181_v49 = vld [vmem:[%s2304_s6] sm:$0xff] }
 0x164   : > { %v1028_v55 = vsel %vm1027_vm4, %v1026_v51, 0.0  ;;  %v1034_v56 = vsel %vm1033_vm5, %v1032_v52, 0.0  ;;  %v1040_v60 = vsel %vm1039_vm6, %v1038_v53, 0.0 }
 0x165   : > { %v1030_v58 = vmul.f32 %v1029_v50, %v1028_v55  ;;  %v1036_v62 = vmul.f32 %v1035_v54, %v1034_v56  ;;  %v1042_v0 = vmul.f32 %v1041_v59, %v1040_v60  ;;  %v1182_v50 = vld [vmem:[%s2304_s6 + $0x8] sm:$0xff] }
 0x167   : > { %v1031_v61 = vadd.f32 %v1030_v58, %v1025_v57 }
 0x169   : > { %v1037_v63 = vadd.f32 %v1036_v62, %v1031_v61 }
 0x16b   : > { %v1043_v2 = vadd.f32 %v1042_v0, %v1037_v63  ;;  %v2406_v48 = vpop.f32.mrf.mxu1 }
 0x16d   : > { %v1048_v3 = vadd.f32 %v1868_v1, %v1043_v2 }
 0x16f   : > { %v1049_v4 = vsub.f32 0.0, %v1048_v3 }
 0x171   : > { %v1050_v7 = vmul.f32 1.442695, %v1049_v4 }
 0x173   : > { %1870 = vpow2.f32 %v1050_v7 }
 0x179   : > { %v1871_v10 = vpop.eup %1870 }
 0x17a   : > { %v1052_v11 = vadd.f32 1.0, %v1871_v10 }
 0x17c   : > { %1872 = vrcp.f32 %v1052_v11  ;;  %v1064_v15 = vand.u32 2147483648, %v1052_v11  ;;  %v1062_v17 = vand.u32 2147483647, %v1052_v11  ;;  %vm1058_vm8 = vweird.f32 %v1052_v11 }
 0x17e   : > { %v1065_v19 = vor.u32 1.1754944e-38, %v1064_v15  ;;  %vm1063_vm10 = vcmp.eq.f32.partialorder %v1062_v17, 8.507059e+37 }
 0x182   : > { %v1873_v12 = vpop.eup %1872 }
 0x183   : > { %v1054_v13 = vmul.f32 %v1873_v12, %v1052_v11  ;;  %vm1059_vm7 = vweird.f32 %v1873_v12 }
 0x184   : > { %vm1060_vm9 = vmor %vm1058_vm8, %vm1059_vm7 }
 0x185   : > { %v1055_v14 = vsub.f32 1.0, %v1054_v13 }
 0x187   : > { %v1056_v16 = vmul.f32 %v1873_v12, %v1055_v14 }
 0x189   : > { %v1057_v18 = vadd.f32 %v1873_v12, %v1056_v16 }
 0x18b   : > { %v1061_v21 = vsel %vm1060_vm9, %v1873_v12, %v1057_v18 }
 0x18c   : > { %v1066_v22 = vsel %vm1063_vm10, %v1065_v19, %v1061_v21 }
 0x18d   : > { %v2392_v23 = vmul.f32 %v1066_v22, %v1048_v3 }
 0x18f   : > { %1753 = vmatmul.msk.f32.vlgmr.msra.gmra.mxu2 %vm1081_vm11, %v2392_v23  ;;  %1754 = vmatmul.msk.f32.vlgmr.msra.gmra.mxu3 %vm1081_vm11, %v2392_v23 }
 0x190   : > { %1755 = vmatmul.msk.f32.vlgmr.msrb.gmra.mxu0 %vm1081_vm11, %v2392_v23 }
 0x20d   : > { %v1175_v24 = vpop.f32.mrf.mxu0 }
 0x20e   : > { %1178 = vst.msk [vmem:[#allocation6] sm:$0xff] %vm1148_vm12, %v1175_v24 }
 0x212   : > { %v1102_v26 = vpop.f32.mrf.mxu2  ;;  %v1145_v27 = vpop.f32.mrf.mxu3 }
 0x213   : > { %v1103_v28 = vadd.f32 %v1869_v25, %v1102_v26  ;;  %1149 = vst.msk [vmem:[#allocation5] sm:$0xff] %vm1148_vm12, %v1145_v27 }
 0x215   : > { %v1106_v29 = vand.u32 2147483647, %v1103_v28  ;;  %v1105_v40 = vmax.f32 %v1103_v28, 0.0 }
 0x217   : > { %v1107_v30 = vsub.f32 0.0, %v1106_v29 }
 0x219   : > { %v1108_v31 = vmul.f32 1.442695, %v1107_v30 }
 0x21b   : > { %1874 = vpow2.f32 %v1108_v31 }
 0x221   : > { %v1875_v32 = vpop.eup %1874 }
 0x222   : > { %v1110_v33 = vadd.f32 1.0, %v1875_v32  ;;  %v1113_v34 = vmul.f32 -0.5, %v1875_v32  ;;  %v1116_v36 = vand.u32 2147483647, %v1875_v32 }
 0x224   : > { %1876 = vlog2.f32 %v1110_v33  ;;  %v1114_v35 = vadd.f32 1.0, %v1113_v34  ;;  %vm1117_vm13 = vcmp.lt.f32.partialorder %v1116_v36, 0.0004427343 }
 0x226   : > { %v1115_v39 = vmul.f32 %v1875_v32, %v1114_v35 }
 0x22a   : > { %v1877_v37 = vpop.eup %1876 }
 0x22b   : > { %v1112_v38 = vmul.f32 0.6931472, %v1877_v37 }
 0x22d   : > { %v1118_v41 = vsel %vm1117_vm13, %v1115_v39, %v1112_v38 }
 0x22e   : > { %v1119_v42 = vadd.f32 %v1118_v41, %v1105_v40 }
 0x230   : > { %v1179_v43 = vmul.f32 %v1119_v42, %v2392_v23  ;;  %v1184_v44 = vrot.slane %v1119_v42, 1  ;;  %v1185_v45 = vrot.slane %v1119_v42, 2  ;;  %v1186_v47 = vrot.slane %v1119_v42, 3 }
 0x231   : > { %v1187_v51 = vrot.slane %v1119_v42, 4  ;;  %v1191_v52 = vperm.slane %v1119_v42, 0  ;;  %v1188_v55 = vrot.slane %v1119_v42, 5  ;;  %v1189_v61 = vrot.slane %v1119_v42, 6 }
 0x232   : > { %1180 = vst.msk [vmem:[#allocation4] sm:$0xff] %vm1081_vm11, %v1179_v43  ;;  %v1192_v53 = vperm.slane %v1184_v44, 0  ;;  %v1193_v54 = vperm.slane %v1185_v45, 0  ;;  %v1194_v56 = vperm.slane %v1186_v47, 0  ;;  %v1190_v0 = vrot.slane %v1119_v42, 7 }
 0x233   : > { %v1207_v57 = vmul.f32 %v1191_v52, %v1181_v49  ;;  %v1208_v58 = vmul.f32 %v1191_v52, %v1182_v50  ;;  %v1195_v62 = vperm.slane %v1187_v51, 0  ;;  %v1196_v1 = vperm.slane %v1188_v55, 0 }
 0x234   : > { %v1209_v59 = vmul.f32 %v1192_v53, %v1181_v49  ;;  %v1210_v60 = vmul.f32 %v1192_v53, %v1182_v50  ;;  %v1211_v63 = vmul.f32 %v1193_v54, %v1181_v49  ;;  %v1212_v2 = vmul.f32 %v1193_v54, %v1182_v50 }
 0x235   : > { %v1213_v3 = vmul.f32 %v1194_v56, %v1181_v49  ;;  %v1223_v4 = vmul.f32 1.442695, %v1207_v57  ;;  %v1225_v5 = vmul.f32 1.442695, %v1208_v58  ;;  %v1214_v7 = vmul.f32 %v1194_v56, %v1182_v50 }
 0x236   : > { %v1227_v6 = vmul.f32 1.442695, %v1209_v59  ;;  %v1229_v8 = vmul.f32 1.442695, %v1210_v60  ;;  %v1197_v9 = vperm.slane %v1189_v61, 0  ;;  %v1215_v10 = vmul.f32 %v1195_v62, %v1181_v49 }
 0x237   : > { %1878 = vpow2.f32 %v1223_v4  ;;  %v1231_v11 = vmul.f32 1.442695, %v1211_v63  ;;  %v1216_v12 = vmul.f32 %v1195_v62, %v1182_v50  ;;  %v1233_v13 = vmul.f32 1.442695, %v1212_v2 }
 0x238   : > { %1880 = vpow2.f32 %v1225_v5  ;;  %v1198_v14 = vperm.slane %v1190_v0, 0  ;;  %v1217_v15 = vmul.f32 %v1196_v1, %v1181_v49  ;;  %v1235_v16 = vmul.f32 1.442695, %v1213_v3 }
 0x239   : > { %1882 = vpow2.f32 %v1227_v6  ;;  %v1218_v17 = vmul.f32 %v1196_v1, %v1182_v50  ;;  %v1237_v18 = vmul.f32 1.442695, %v1214_v7  ;;  %v1219_v19 = vmul.f32 %v1197_v9, %v1181_v49 }
 0x23a   : > { %1884 = vpow2.f32 %v1229_v8  ;;  %v1239_v21 = vmul.f32 1.442695, %v1215_v10  ;;  %v1220_v22 = vmul.f32 %v1197_v9, %v1182_v50  ;;  %v1241_v24 = vmul.f32 1.442695, %v1216_v12 }
 0x23b   : > { %1886 = vpow2.f32 %v1231_v11  ;;  %v1221_v26 = vmul.f32 %v1198_v14, %v1181_v49  ;;  %v1243_v27 = vmul.f32 1.442695, %v1217_v15  ;;  %v1222_v29 = vmul.f32 %v1198_v14, %v1182_v50 }
 0x23c   : > { %1888 = vpow2.f32 %v1233_v13  ;;  %v1245_v30 = vmul.f32 1.442695, %v1218_v17  ;;  %v1247_v32 = vmul.f32 1.442695, %v1219_v19  ;;  %v1249_v34 = vmul.f32 1.442695, %v1220_v22 }
 0x23d   : > { %v1879_v25 = vpop.eup %1878  ;;  %1890 = vpow2.f32 %v1235_v16  ;;  %v1251_v36 = vmul.f32 1.442695, %v1221_v26  ;;  %v1253_v38 = vmul.f32 1.442695, %v1222_v29  ;;  %v2037_v51 = vmov 0.0  }
 0x23e   : > { %v1881_v28 = vpop.eup %1880  ;;  %1892 = vpow2.f32 %v1237_v18  ;;  %1255 = vst.msk [vmem:[#allocation7] sm:$0xff] %vm1081_vm11, %v1879_v25  ;;  %v2041_v52 = vmov 0.0  }
 0x23f   : > { %v1883_v31 = vpop.eup %1882  ;;  %1894 = vpow2.f32 %v1239_v21  ;;  %1256 = vst.msk [vmem:[#allocation7 + $0x8] sm:$0xff] %vm1081_vm11, %v1881_v28 }
 0x240   : > { %v1885_v33 = vpop.eup %1884  ;;  %1896 = vpow2.f32 %v1241_v24  ;;  %1257 = vst.msk [vmem:[#allocation7 + $0x10] sm:$0xff] %vm1081_vm11, %v1883_v31 }
 0x241   : > { %v1887_v35 = vpop.eup %1886  ;;  %1898 = vpow2.f32 %v1243_v27  ;;  %1258 = vst.msk [vmem:[#allocation7 + $0x18] sm:$0xff] %vm1081_vm11, %v1885_v33 }
 0x242   : > { %v1889_v37 = vpop.eup %1888  ;;  %1900 = vpow2.f32 %v1245_v30  ;;  %1259 = vst.msk [vmem:[#allocation7 + $0x20] sm:$0xff] %vm1081_vm11, %v1887_v35 }
 0x243   : > { %v1891_v39 = vpop.eup %1890  ;;  %1902 = vpow2.f32 %v1247_v32  ;;  %1260 = vst.msk [vmem:[#allocation7 + $0x28] sm:$0xff] %vm1081_vm11, %v1889_v37 }
 0x244   : > { %v1893_v40 = vpop.eup %1892  ;;  %1904 = vpow2.f32 %v1249_v34  ;;  %1261 = vst.msk [vmem:[#allocation7 + $0x30] sm:$0xff] %vm1081_vm11, %v1891_v39 }
 0x245   : > { %v1895_v41 = vpop.eup %1894  ;;  %1906 = vpow2.f32 %v1251_v36  ;;  %1262 = vst.msk [vmem:[#allocation7 + $0x38] sm:$0xff] %vm1081_vm11, %v1893_v40 }
 0x246   : > { %v1897_v42 = vpop.eup %1896  ;;  %1908 = vpow2.f32 %v1253_v38  ;;  %1263 = vst.msk [vmem:[#allocation7 + $0x40] sm:$0xff] %vm1081_vm11, %v1895_v41 }
 0x247   : > { %v1899_v43 = vpop.eup %1898  ;;  %1264 = vst.msk [vmem:[#allocation7 + $0x48] sm:$0xff] %vm1081_vm11, %v1897_v42 }
 0x248   : > { %v1901_v44 = vpop.eup %1900  ;;  %1265 = vst.msk [vmem:[#allocation7 + $0x50] sm:$0xff] %vm1081_vm11, %v1899_v43 }
 0x249   : > { %v1903_v45 = vpop.eup %1902  ;;  %1266 = vst.msk [vmem:[#allocation7 + $0x58] sm:$0xff] %vm1081_vm11, %v1901_v44 }
 0x24a   : > { %v1905_v47 = vpop.eup %1904  ;;  %1267 = vst.msk [vmem:[#allocation7 + $0x60] sm:$0xff] %vm1081_vm11, %v1903_v45 }
 0x24b   : > { %v1907_v49 = vpop.eup %1906  ;;  %1268 = vst.msk [vmem:[#allocation7 + $0x68] sm:$0xff] %vm1081_vm11, %v1905_v47 }
 0x24c   : > { %v1909_v50 = vpop.eup %1908  ;;  %1269 = vst.msk [vmem:[#allocation7 + $0x70] sm:$0xff] %vm1081_vm11, %v1907_v49 }
 0x24d   : > { %1270 = vst.msk [vmem:[#allocation7 + $0x78] sm:$0xff] %vm1081_vm11, %v1909_v50 }
 0x24e LB: >> { %1910 = vset.pattern.permute.xlu0 %v2375_v46  ;;  %1912 = vset.pattern.permute.xlu1 %v2375_v46  ;;  %s1279_s0 = scalar_lea.vmem [#allocation5], %s2047_s21  ;;  %s1283_s6 = scalar_lea.vmem [#allocation6], %s2047_s21  ;;  %v1300_v55 = vadd.s32 8, %v2375_v46  ;;  %vm1334_vm14 = vcmask 516096   ;;  %s2047_s21 = sphi %s2427_s21, %s1276_s21   ;;  %v2043_v52 = vphi %v2041_v52, %v1307_v52   ;;  %v2039_v51 = vphi %v2037_v51, %v1308_v51  }
 0x24f   : >> { %v1914_v53 = vld [vmem:[%s1279_s0] ss:$0 sm:$0xff]  ;;  %s1281_s12 = scalar_lea.vmem [#allocation4], %s2047_s21  ;;  %s1756_s19 = sshll.u32 %s2047_s21, 4 }
 0x250   : >> { %v1915_v54 = vld [vmem:[%s1283_s6] ss:$0 sm:$0xff]  ;;  %s1286_s29 = scalar_lea.vmem [#allocation7], %s1756_s19  ;;  %s1333_s24 = scalar_lea.vmem [#allocation3], %s2047_s21 }
 0x251   : >> { %v1916_v57 = vld [vmem:[%s1281_s12] ss:$0 sm:$0xff]  ;;  %s1276_s21 = sadd.s32 1, %s2047_s21  }
 0x252   : >> { %p1273_p1 = scmp.ge.s32.totalorder %s1276_s21, 8  }
 0x253   : > { %v1371_v14 = vld [vmem:[%s2309_s7 + $0x38] sm:$0xff] (%p1273_p1)  ;;  %v1370_v15 = vld [vmem:[%s2309_s7 + $0x30] sm:$0xff] (%p1273_p1)  ;;  %v1343_v16 = vsub.f32 (%p1273_p1), 0.0, %v2406_v48  ;;  %v1369_v17 = vld [vmem:[%s2309_s7 + $0x28] sm:$0xff] (%p1273_p1)  ;;  %s2629_s8 = sld [smem:[#allocation37_spill]] (%p1273_p1) }
 0x254   : >> { %v1287_v56 = vld [vmem:[%s1286_s29] sm:$0xff]  ;;  %v1288_v62 = vld [vmem:[%s1286_s29 + $0x8] sm:$0xff]  ;;  %1383 = vmatpush.msrb.mxu1 (%p1273_p1), %v1371_v14  ;;  %v1367_v46 = vld [vmem:[%s2309_s7 + $0x18] sm:$0xff] (%p1273_p1) }
 0x255   : >> { %v1289_v58 = vmul.f32 %v2043_v52, %v1287_v56  ;;  %v1290_v63 = vmul.f32 %v2039_v51, %v1288_v62  ;;  %v1344_v18 = vmul.f32 (%p1273_p1), 1.442695, %v1343_v16  ;;  %v1368_v19 = vld [vmem:[%s2309_s7 + $0x20] sm:$0xff] (%p1273_p1)  ;;  %v1366_v21 = vld [vmem:[%s2309_s7 + $0x10] sm:$0xff] (%p1273_p1)  ;;  %v1365_v24 = vld [vmem:[%s2309_s7 + $0x8] sm:$0xff] (%p1273_p1) }
 0x256   : >> { %1296 = vperm.xlu0 %1910, %v1914_v53   ;;  %1314 = vperm.xlu1 %1912, %v1915_v54   ;;  %v1364_v26 = vld [vmem:[%s2309_s7] sm:$0xff] (%p1273_p1) }
 0x257   : > { %1384 = vmatpush.msrb.mxu1 (%p1273_p1), %v1370_v15  ;;  %1918 = vpow2.f32 (%p1273_p1), %v1344_v18 }
 0x259   : > { %1385 = vmatpush.msrb.mxu1 (%p1273_p1), %v1369_v17  ;;  %s2630_s20 = scalar_lea.vmem (%p1273_p1), %s2629_s8, %s2238_s2  ;;  %s2631_s2 = sld [smem:[#allocation14_spill]] (%p1273_p1) }
 0x25a   : > { %v1917_v28 = vld [vmem:[%s2630_s20] ss:$0 sm:$0xff] (%p1273_p1) }
 0x25b   : > { %1386 = vmatpush.msrb.mxu1 (%p1273_p1), %v1368_v19  ;;  %v1341_v33 = vmul.f32 (%p1273_p1), %v1917_v28, %v2392_v23 }
 0x25d   : > { %1387 = vmatpush.msrb.mxu1 (%p1273_p1), %v1367_v46  ;;  %v1919_v22 = vpop.eup (%p1273_p1), %1918 }
 0x25e   : >> { %1911 = vset.pattern.permute.xlu0 %v1300_v55  ;;  %1913 = vset.pattern.permute.xlu1 %v1300_v55  ;;  %v1346_v25 = vadd.f32 (%p1273_p1), 1.0, %v1919_v22 }
 0x25f   : > { %1388 = vmatpush.msrb.mxu1 (%p1273_p1), %v1366_v21  ;;  %p1758_p2 = scmp.ne.s32.totalorder (%p1273_p1), %s2631_s2, 1 }
 0x260   : > { %1920 = vrcp.f32 (%p1273_p1), %v1346_v25  ;;  %v1358_v30 = vand.u32 (%p1273_p1), 2147483648, %v1346_v25  ;;  %vm1352_vm15 = vweird.f32 (%p1273_p1), %v1346_v25  ;;  %v1356_v32 = vand.u32 (%p1273_p1), 2147483647, %v1346_v25 }
 0x261   : > { %1389 = vmatpush.msrb.mxu1 (%p1273_p1), %v1365_v24 }
 0x262   : > { %v1359_v36 = vor.u32 (%p1273_p1), 1.1754944e-38, %v1358_v30  ;;  %vm1357_vm2 = vcmp.eq.f32.partialorder (%p1273_p1), %v1356_v32, 8.507059e+37 }
 0x263   : > { %1390 = vmatpush.msrb.mxu1 (%p1273_p1), %v1364_v26 }
 0x266   : >> { %1302 = vperm.xlu0 %1911, %v1914_v53   ;;  %1320 = vperm.xlu1 %1913, %v1915_v54   ;;  %v1921_v27 = vpop.eup (%p1273_p1), %1920 }
 0x267   : > { %v1348_v29 = vmul.f32 (%p1273_p1), %v1921_v27, %v1346_v25  ;;  %vm1353_vm0 = vweird.f32 (%p1273_p1), %v1921_v27 }
 0x268   : > { %vm1354_vm1 = vmor (%p1273_p1), %vm1352_vm15, %vm1353_vm0 }
 0x269   : > { %v1349_v31 = vsub.f32 (%p1273_p1), 1.0, %v1348_v29 }
 0x26b   : > { %v1350_v34 = vmul.f32 (%p1273_p1), %v1921_v27, %v1349_v31 }
 0x26d   : > { %v1351_v37 = vadd.f32 (%p1273_p1), %v1921_v27, %v1350_v34 }
 0x26f   : > { %v1355_v39 = vsel (%p1273_p1), %vm1354_vm1, %v1921_v27, %v1351_v37 }
 0x270   : > { %v1360_v40 = vsel (%p1273_p1), %vm1357_vm2, %v1359_v36, %v1355_v39 }
 0x271   : > { %v1362_v41 = vmul.f32 (%p1273_p1), %v1360_v40, %v2406_v48 }
 0x2c8   : >> { %v1297_v59 = vpop.permute.xlu0 %1296  ;;  %v1315_v61 = vpop.permute.xlu1 %1314 }
 0x2c9   : >> { %v1305_v60 = vmul.f32 %v1916_v57, %v1297_v59 }
 0x2cb   : >> { %v1307_v52 = vadd.f32 %v1305_v60, %v1289_v58  }
 0x2cd   : >> { %v1322_v3 = vmul.f32 %v1315_v61, %v1307_v52 }
 0x2cf   : >> { %v1324_v5 = vsel %vm1081_vm11, %v1322_v3, 0.0 }
 0x2d8   : >> { %v1303_v0 = vpop.permute.xlu0 %1302  ;;  %v1321_v2 = vpop.permute.xlu1 %1320 }
 0x2d9   : >> { %v1306_v1 = vmul.f32 %v1916_v57, %v1303_v0 }
 0x2db   : >> { %v1308_v51 = vadd.f32 %v1306_v1, %v1290_v63  }
 0x2dd   : >> { %v1323_v4 = vmul.f32 %v1321_v2, %v1308_v51 }
 0x2df   : >> { %v1325_v6 = vsel %vm1081_vm11, %v1323_v4, 0.0 }
 0x2e0   : >> { %v1326_v7 = vadd.f32 %v1325_v6, %v1324_v5 }
 0x2e2   : >> { %v1327_v8 = vrot.slane %v1326_v7, 4 }
 0x2e4   : >> { %v1328_v9 = vadd.f32 %v1327_v8, %v1326_v7 }
 0x2e6   : >> { %v1329_v10 = vrot.slane %v1328_v9, 2 }
 0x2e8   : >> { %v1330_v11 = vadd.f32 %v1329_v10, %v1328_v9 }
 0x2ea   : >> { %v1331_v12 = vrot.slane %v1330_v11, 1  ;;  %1275 = sbr.rel (!%p1273_p1) target bundleno = 590 (0x24e), region = 198 }
 0x2ec   : >> { %v1332_v13 = vadd.f32 %v1331_v12, %v1330_v11 }
 0x2ee   : >> { %1335 = vst.msk [vmem:[%s1333_s24] sm:$0x1] %vm1334_vm14, %v1332_v13 }
 0x2ef   : > { %s2632_s25 = sld [smem:[#allocation40_spill]] (!%p1758_p2) }
 0x2f0   : > { %s2634_s0 = sld [smem:[#allocation38_spill]] (!%p1758_p2) }
 0x2f1   : > { %s2635_s19 = sld [smem:[#allocation39_spill]] (!%p1758_p2) }
 0x2f2   : > { %s2636_s30 = sld [smem:[#allocation41_spill]] (!%p1758_p2) }
 0x2f5   : > { %v1336_v35 = vld [vmem:[#allocation3] sm:$0xff]  ;;  %s2633_s4 = smov (!%p1758_p2), %s2632_s25 }
 0x2f6   : > { %v1342_v38 = vadd.f32 %v1341_v33, %v1336_v35 }
 0x2f8   : > { %v1363_v42 = vmul.f32 %v1362_v41, %v1342_v38 }
 0x2fa   : > { %1757 = vmatmul.msk.f32.vlgmr.msrb.gmra.mxu1 %vm1081_vm11, %v1363_v42 }
 0x376   : > { %1400 = sbr.rel (%p1758_p2) target bundleno = 1290 (0x50a), region = 119 }
 0x377   : > { %v1392_v43 = vpop.f32.mrf.mxu1 }
 0x378   : > { %v1395_v44 = vadd.f32 %v1392_v43, %v2347_v20 }
 0x37a   : > { %1396 = vst.msk [vmem:[#allocation2] sm:$0xff] %vm973_vm3, %v1395_v44 }
 0x37b   : > { %v1403_v23 = vsel %vm973_vm3, %v1395_v44, 0.0  ;;  %v2049_v45 = vmov 32.0   ;;  %v1443_v57 = vld [vmem:[%s2632_s25 + $0x18] sm:$0xff]  ;;  %v1442_v58 = vld [vmem:[%s2633_s4 + $0x10] sm:$0xff]  ;;  %v1441_v59 = vld [vmem:[%s2633_s4 + $0x8] sm:$0xff]  ;;  %vm1472_vm8 = vcmask 254976  }
 0x37c   : > { %1404 = vadd.xlane.f32.xlu0 %v1403_v23  ;;  %1925 = vrcp.f32 %v2049_v45  ;;  %1464 = vmatpush.msra.mxu0 %v1443_v57  ;;  %v1440_v60 = vld [vmem:[%s2633_s4] sm:$0xff] }
 0x37d   : > { %v1922_v6 = vld [vmem:[%s2634_s0] ss:$0 sm:$0xff] }
 0x37e   : > { %1465 = vmatpush.msra.mxu0 %v1442_v58  ;;  %v1923_v9 = vld [vmem:[%s2635_s19] ss:$0 sm:$0xff] }
 0x37f   : > { %v1924_v13 = vld [vmem:[%s2636_s30] ss:$0 sm:$0xff] }
 0x380   : > { %1466 = vmatpush.msra.mxu0 %v1441_v59 }
 0x382   : > { %v1926_v47 = vpop.eup %1925  ;;  %1467 = vmatpush.msra.mxu0 %v1440_v60 }
 0x383   : > { %v1407_v49 = vmul.f32 32.0, %v1926_v47  ;;  %vm1411_vm4 = vweird.f32 %v1926_v47 }
 0x385   : > { %v1408_v50 = vsub.f32 1.0, %v1407_v49 }
 0x387   : > { %v1409_v48 = vmul.f32 %v1926_v47, %v1408_v50 }
 0x389   : > { %v1410_v51 = vadd.f32 %v1926_v47, %v1409_v48 }
 0x38b   : > { %v1412_v52 = vsel %vm1411_vm4, %v1926_v47, %v1410_v51 }
 0x3ef   : > { %v1405_v53 = vpop.xlane.xlu0 %1404 }
 0x3f0   : > { %v1413_v54 = vmul.f32 %v1412_v52, %v1405_v53 }
 0x3f2   : > { %v1414_v20 = vsub.f32 %v1395_v44, %v1413_v54 }
 0x3f4   : > { %v1415_v55 = vmul.f32 %v1414_v20, %v1414_v20 }
 0x3f6   : > { %v1416_v56 = vsel %vm973_vm3, %v1415_v55, 0.0 }
 0x3f7   : > { %1417 = vadd.xlane.f32.xlu0 %v1416_v56 }
 0x46a   : > { %v1418_v61 = vpop.xlane.xlu0 %1417 }
 0x46b   : > { %v1419_v62 = vmul.f32 %v1418_v61, %v1412_v52 }
 0x46d   : > { %v1420_v63 = vadd.f32 1e-05, %v1419_v62 }
 0x46f   : > { %1927 = vrsqrt.f32 %v1420_v63  ;;  %vm1427_vm6 = vweird.f32 %v1420_v63 }
 0x475   : > { %v1928_v0 = vpop.eup %1927 }
 0x476   : > { %v1422_v1 = vmul.f32 %v1928_v0, %v1420_v63  ;;  %vm1428_vm5 = vweird.f32 %v1928_v0 }
 0x477   : > { %vm1429_vm7 = vmor %vm1427_vm6, %vm1428_vm5 }
 0x478   : > { %v1423_v2 = vmul.f32 %v1928_v0, %v1422_v1 }
 0x47a   : > { %v1424_v3 = vmul.f32 0.5, %v1423_v2 }
 0x47c   : > { %v1425_v4 = vsub.f32 1.5, %v1424_v3 }
 0x47e   : > { %v1426_v5 = vmul.f32 %v1928_v0, %v1425_v4 }
 0x480   : > { %v1430_v7 = vsel %vm1429_vm7, %v1928_v0, %v1426_v5 }
 0x481   : > { %v1431_v8 = vmul.f32 %v1430_v7, %v1414_v20 }
 0x483   : > { %v1435_v10 = vmul.f32 %v1922_v6, %v1431_v8 }
 0x485   : > { %v1439_v11 = vadd.f32 %v1923_v9, %v1435_v10 }
 0x487   : > { %v1449_v12 = vrot.slane %v1439_v11, 6 }
 0x489   : > { %1759 = vmatmul.msk.f32.vlgmr.msra.gmra.mxu0 %vm973_vm3, %v1449_v12 }
 0x506   : > { %v1469_v14 = vpop.f32.mrf.mxu0 }
 0x507   : > { %v1470_v15 = vadd.f32 %v1924_v13, %v1469_v14 }
 0x509   : > { %1473 = vst.msk [vmem:[%s836_s5] sm:$0x3] %vm1472_vm8, %v1470_v15 }
 0x50a PF: > { %s2637_s26 = sld [smem:[#allocation15_spill]]  ;;  %s1487_s27 = sshll.u32 %s836_s5, 4  ;;  %s1488_s27 = int_to_ptr.vmem [resolvable:$true] %s1487_s27 }
 0x50b   : > { %s2638_s8 = sld [smem:[#allocation12_spill]] }
 0x50c   : > { %s2640_s25 = sld [smem:[#allocation42_spill]] }
 0x510   : > { %s1761_s2 = sshll.u32 %s2637_s26, 1 }
 0x511   : > { %s2642_s22 = sand.u32 1, %s2638_s8  }
 0x512   : > { %s2641_s17 = smov %s2640_s25  ;;  %s1485_s18 = scalar_lea.hbm %s2640_s25, %s1761_s2 }
 0x513   : > { %s1489_s23 = sshll.u32 %s1485_s18, 4  ;;  %s1475_s3 = scalar_lea.sflag [#allocation9], %s2642_s22  ;;  %s1490_s23 = int_to_ptr.hbm [resolvable:$true] %s1489_s23 }
 0x514   : > { %s1943_s1 = sshra.s32 %s1490_s23, 4  ;;  %s1949_s12 = scalar_lea.hbm %s2641_s17, 4  ;;  %s1944_s1 = int_to_ptr.hbm [resolvable:$true] %s1943_s1 }
 0x515   : > { %s1945_s21 = scalar_lea.hbm %s1944_s1, 2  ;;  %p1950_p7 = scmp.lt.s32.totalorder %s1944_s1, %s2641_s17 }
 0x516   : > { %p1946_p4 = scmp.ne.s32.totalorder %s1944_s1, %s1945_s21  ;;  %p1951_p8 = scmp.lt.s32.totalorder %s1949_s12, %s1945_s21 }
 0x518   : > { %p1947_p5 = pnand %p1946_p4, %p2209_p3  ;;  %p1952_p10 = por %p1951_p8, %p1950_p7 }
 0x51a   : > { %p1948_p6 = pneg %p1947_p5 }
 0x51c   : > { %p1953_p11 = pnand %p1952_p10, %p1948_p6 }
 0x51e   : > { %1956 = shalt.err (!%p1953_p11)
}
 0x51f   : > { %1771 = dma.vmem_to_hbm [thread:$0]  (%p2209_p3), %s1488_s27, 32, %s1490_s23, %s1475_s3  }
 0x520 PF: > { %s2643_s28 = sld [smem:[#allocation18_spill]] }
 0x521   : > { %s2644_s5 = sld [smem:[#allocation11_spill]] }
 0x526   : > { %p1777_p12 = scmp.ge.s32.totalorder %s2643_s28, 2 }
 0x527   : > { %s1501_s30 = sand.u32 1, %s2644_s5  }
 0x528   : > { %p1774_p13 = pnand %p1777_p12, %p2219_p9  ;;  %s1502_s26 = scalar_lea.sflag [#allocation9], %s1501_s30 }
 0x52a   : > { %p1775_p0 = pneg %p1774_p13 }
 0x52c   : > { %2002 = dma.done.wait (%p1775_p0), %s1502_s26, 32  }
 0x52d   : > { %2004 = vsyncadd (%p1775_p0), %s1502_s26, 4294967264  ;;  %s34_s0 = sadd.s32 1, %s2643_s28   ;;  %s2646_s2 = sld [smem:[#allocation12_spill]] }
 0x52e   : > { %p31_p1 = scmp.ge.s32.totalorder %s34_s0, 6   ;;  %s2647_s25 = sld [smem:[#allocation13_spill]] }
 0x52f   : > { %s2648_s26 = sld [smem:[#allocation23_spill]] }
 0x530   : > { %s2649_s27 = sld [smem:[#allocation16_spill]]  ;;  %33 = sbr.rel (!%p31_p1) target bundleno = 24 (0x18), region = 209 }
 0x531   : > { %s2650_s3 = sld [smem:[#allocation17_spill]] }
 0x532   : > { %s2651_s28 = sld [smem:[#allocation19_spill]] }
 0x533   : > { %s2652_s29 = sld [smem:[#allocation21_spill]] }
 0x535   :  { %1508 = vsyncpa [#allocation9], 1 }
 0x536   :  { %1510 = vsyncpa [#allocation9 + $0x1], 1 }

</bundles_post_ra>
